<compile_context>
chip_gen: v7x
topology: tpu7x:2x2x1
jax: 0.10.0
libtpu: 0.0.40
codegen_flags: <defaults>
</compile_context>

<pallas_src>
import functools
import math

import jax
import jax.numpy as jnp
from jax import lax
from jax.experimental import pallas as pl
from jax.experimental.pallas import tpu as pltpu


MXU_DTYPE = jnp.bfloat16   # matmul-operand dtype; accumulation is always f32


# ----------------------------------------------------------------------------- config
class Cfg:
    hidden = 32
    hidden_attn = 32
    hidden_ff = 64
    n_heads = 4
    block_size = 4
    projection = "mean"
    inner_attn = True
    efficient_attn = False
    outer_attn = "softmax"          # anything != 'scaled'
    attn_skip_connection = True
    bias = False                    # bias of proj_q / proj_k / proj_v
    dropout = 0.0
    dropout_attn = 0.0
    eps = 1e-12                     # CustomLayerNorm variance epsilon


# ----------------------------------------------------------------------------- helpers
def _erf(z):
    # TODO(synk): exact lax.erf may not lower in Mosaic; Abramowitz&Stegun 7.1.26
    # rational approximation (|abs err| <= 1.5e-7, ~float32 precision).
    a1, a2, a3, a4, a5 = 0.254829592, -0.284496736, 1.421413741, -1.453152027, 1.061405429
    p = 0.3275911
    az = jnp.abs(z)
    t = 1.0 / (1.0 + p * az)
    poly = ((((a5 * t + a4) * t + a3) * t + a2) * t + a1) * t
    y = 1.0 - poly * jnp.exp(-(az * az))
    return jnp.where(z < 0.0, -y, y)


# ----------------------------------------------------------------------------- fused kernel
def _fused_layer_kernel(
    # per-grid-step inputs (leading batch-tile dim squeezed by BlockSpec)
    x_ref,        # (NBT, D)  NB batch rows flattened along sublanes
    mask_ref,     # (NBT, 1)  query/time mask
    # shared constants / weights (VMEM resident, same block every step)
    pool_ref,     # (K, NBT)  block-diagonal block-mean pooling matrix (1/BS)
    same_ref,     # (NBT, K)  same-batch selector: 1 iff time row & pooled row share a batch row
    w_x_ref,      # (D, D+Da)   [W_proj_lin | W_q_outer]   (fused: both consume raw x)
    w_qkv1_ref,   # (D, 2Da+D)  inner attn [Wq|Wk|Wv]
    w_kv2_ref,    # (D, Da+D)   outer attn [Wk|Wv]
    w_tp_ref,     # (D, D)      TransformerLayer.proj
    w_fc1_ref,    # (D, Dff)    pwff.fc1
    w_fc2_ref,    # (Dff, D)    pwff.fc2
    vec_ref,      # (8, VW) f32 slab: b_pl, b_tp, ln1_g, ln1_b, b_fc1, b_fc2, ln2_g, ln2_b
    o_ref,        # (NBT, D)
    *, n_heads, d_attn, d_hidden, d_ff, block_size, eps, mxu_dtype,
):
    f32 = jnp.float32
    H = n_heads
    D = d_hidden
    Da = d_attn
    dh_a = Da // H
    dh_v = D // H
    inv_scale = 1.0 / math.sqrt(D // H)   # torch: / sqrt(d // n_heads), d = hidden

    x = x_ref[...]            # (NBT, D) f32
    mask = mask_ref[...]      # (NBT, 1) f32
    pool = pool_ref[...]      # (K, NBT) f32
    same_out = same_ref[...]  # (NBT, K) f32
    K = pool.shape[0]

    # ---- masks: pooled-block mask + additive key biases, all derived from `mask` ----
    # pmask[p] = clamp(sum_{t in block p} mask[t], 0, 1)              (column, (K,1))
    pmask = jnp.minimum(
        float(block_size) * jnp.dot(pool, mask, preferred_element_type=f32), 1.0)
    # diag(pmask) via iota (avoids a sublane->lane transpose); key-validity matrices
    # pick up both the pooled mask and the "same batch row" block-diagonal structure.
    kr = lax.broadcasted_iota(jnp.int32, (K, K), 0)
    kc = lax.broadcasted_iota(jnp.int32, (K, K), 1)
    pmask_diag = jnp.where(kr == kc, pmask, 0.0)                            # (K, K)
    keyv_out = jnp.dot(same_out, pmask_diag, preferred_element_type=f32)    # (NBT, K)
    keyv_in = jnp.dot(pool, keyv_out, preferred_element_type=f32)           # (K, K)
    kb_out = -10000.0 * (1.0 - keyv_out)
    kb_in = -10000.0 * (1.0 - keyv_in)

    # ---- fused x @ [W_proj_lin | W_q_outer] ----------------------------------------
    xw = jnp.dot(x.astype(mxu_dtype), w_x_ref[...], preferred_element_type=f32)
    xl = (xw[:, :D] + vec_ref[0:1, :D]) * mask          # Projection.linear, masked
    q2 = xw[:, D:] * (mask * inv_scale)                 # outer-attn queries (masked, pre-scaled)
    x_pool = jnp.dot(pool, xl, preferred_element_type=f32)   # (K, D) block-mean pooling

    def mha(q, k, v, kbias):
        # q already carries mask_q * 1/sqrt(d_h); kbias is the additive key mask.
        q16 = q.astype(mxu_dtype)
        k16 = k.astype(mxu_dtype)
        v16 = v.astype(mxu_dtype)
        outs = []
        for hd in range(H):                               # static unroll, H=4
            qh = q16[:, hd * dh_a:(hd + 1) * dh_a]        # (Tq, dh)
            kh = k16[:, hd * dh_a:(hd + 1) * dh_a]        # (Tk, dh)
            vh = v16[:, hd * dh_v:(hd + 1) * dh_v]        # (Tk, dh)
            s = jnp.einsum("qd,kd->qk", qh, kh, preferred_element_type=f32)
            s = s + kbias
            s = s - jnp.max(s, axis=-1, keepdims=True)
            e = jnp.exp(s)
            p = e * pl.reciprocal(jnp.sum(e, axis=-1, keepdims=True), approx=True)
            outs.append(jnp.dot(p.astype(mxu_dtype), vh, preferred_element_type=f32))
        return jnp.concatenate(outs, axis=-1)             # (Tq, D)

    # ---- inner (vanilla) self-attention on the pooled sequence, fused QKV ----------
    qkv1 = jnp.dot(x_pool.astype(mxu_dtype), w_qkv1_ref[...], preferred_element_type=f32)
    q1 = qkv1[:, :Da] * (pmask * inv_scale)
    k1 = qkv1[:, Da:2 * Da]
    v1 = qkv1[:, 2 * Da:]
    x_proj = mha(q1, k1, v1, kb_in)                       # (K, D)

    # ---- outer attention: queries from x, keys/values from x_proj, fused KV --------
    kv2 = jnp.dot(x_proj.astype(mxu_dtype), w_kv2_ref[...], preferred_element_type=f32)
    k2 = kv2[:, :Da]
    v2 = kv2[:, Da:]
    h = mha(q2, k2, v2, kb_out) + x                       # attn_skip_connection

    # ---- TransformerLayer head: proj -> LN1 -> PWFF(erf-gelu) -> LN2 ---------------
    h_proj = jnp.dot(h.astype(mxu_dtype), w_tp_ref[...],
                     preferred_element_type=f32) + vec_ref[1:2, :D]

    def layer_norm(z, g, b):
        u = jnp.mean(z, axis=-1, keepdims=True)
        zc = z - u
        s = jnp.mean(zc * zc, axis=-1, keepdims=True)
        return g * (zc * lax.rsqrt(s + eps)) + b

    h1 = layer_norm(x + h_proj, vec_ref[2:3, :D], vec_ref[3:4, :D])

    ff = jnp.dot(h1.astype(mxu_dtype), w_fc1_ref[...],
                 preferred_element_type=f32) + vec_ref[4:5, :d_ff]
    ff = ff * 0.5 * (1.0 + _erf(ff * (1.0 / math.sqrt(2.0))))
    ff = jnp.dot(ff.astype(mxu_dtype), w_fc2_ref[...],
                 preferred_element_type=f32) + vec_ref[5:6, :D]

    o_ref[...] = layer_norm(h1 + ff, vec_ref[6:7, :D], vec_ref[7:8, :D])


# ----------------------------------------------------------------------------- wrapper
def transformer_layer_forward(params, x, mask, cfg, rows_per_step=8):
    N, T, D = x.shape
    Da, H, BS, Dff = cfg.hidden_attn, cfg.n_heads, cfg.block_size, cfg.hidden_ff
    TP = T // BS
    f32 = jnp.float32
    mxu = MXU_DTYPE

    # --- batch tiling: NB rows per grid step, flattened along sublanes --------------
    NB = max(1, min(rows_per_step, N))
    G = pl.cdiv(N, NB)
    Npad = G * NB
    x = x.astype(f32)
    mask = mask.astype(f32)
    if Npad != N:
        x = jnp.pad(x, ((0, Npad - N), (0, 0), (0, 0)))
        mask = jnp.pad(mask, ((0, Npad - N), (0, 0)))      # padded rows fully masked

    NBT = NB * T
    K = NB * TP
    xb = x.reshape(G, NBT, D)
    maskb = mask.reshape(G, NBT, 1)

    # --- static block-diagonal helpers (shared by every grid step) ------------------
    t_ids = jnp.arange(NBT, dtype=jnp.int32)
    p_ids = jnp.arange(K, dtype=jnp.int32)
    pool = (t_ids[None, :] // BS == p_ids[:, None]).astype(f32) / BS       # (K, NBT)
    same_out = (t_ids[:, None] // T == p_ids[None, :] // TP).astype(f32)   # (NBT, K)

    # --- weight packing: fused [W_proj|W_q_outer], QKV, KV; bf16 MXU operands -------
    w_x = jnp.concatenate([params["proj_lin_w"], params["oa_wq"]], axis=1).astype(mxu)
    w_qkv1 = jnp.concatenate([params["pa_wq"], params["pa_wk"], params["pa_wv"]],
                             axis=1).astype(mxu)
    w_kv2 = jnp.concatenate([params["oa_wk"], params["oa_wv"]], axis=1).astype(mxu)
    w_tp = params["tl_proj_w"].astype(mxu)
    w_fc1 = params["fc1_w"].astype(mxu)
    w_fc2 = params["fc2_w"].astype(mxu)

    # --- all bias / LayerNorm vectors in one f32 slab --------------------------------
    VW = max(D, Dff)

    def row(v):
        v = v.reshape(1, -1).astype(f32)
        return jnp.pad(v, ((0, 0), (0, VW - v.shape[1])))

    vec = jnp.concatenate([
        row(params["proj_lin_b"]), row(params["tl_proj_b"]),
        row(params["ln1_g"]), row(params["ln1_b"]),
        row(params["fc1_b"]), row(params["fc2_b"]),
        row(params["ln2_g"]), row(params["ln2_b"]),
    ], axis=0)                                                             # (8, VW)

    kernel = functools.partial(
        _fused_layer_kernel,
        n_heads=H, d_attn=Da, d_hidden=D, d_ff=Dff,
        block_size=BS, eps=cfg.eps, mxu_dtype=mxu)

    def step_spec(shape):        # per-step blocks, leading grid dim squeezed
        return pl.BlockSpec((None,) + shape, lambda g: (g,) + (0,) * len(shape))

    def shared_spec(shape):      # whole-array resident blocks (weights / constants)
        return pl.BlockSpec(shape, lambda g: (0,) * len(shape))

    out = pl.pallas_call(
        kernel,
        out_shape=jax.ShapeDtypeStruct((G, NBT, D), f32),
        grid=(G,),
        in_specs=[
            step_spec((NBT, D)),                 # x
            step_spec((NBT, 1)),                 # mask
            shared_spec((K, NBT)),               # pooling matrix
            shared_spec((NBT, K)),               # same-batch selector
            shared_spec((D, D + Da)),            # [W_proj_lin | W_q_outer]
            shared_spec((D, 2 * Da + D)),        # inner attn [Wq|Wk|Wv]
            shared_spec((D, Da + D)),            # outer attn [Wk|Wv]
            shared_spec((D, D)),                 # TransformerLayer.proj
            shared_spec((D, Dff)),               # fc1
            shared_spec((Dff, D)),               # fc2
            shared_spec((8, VW)),                # bias / LN slab
        ],
        out_specs=step_spec((NBT, D)),
        compiler_params=pltpu.CompilerParams(
            dimension_semantics=("parallel",),   # batch tiles may shard over TCs
        ),
    )(xb, maskb, pool, same_out, w_x, w_qkv1, w_kv2, w_tp, w_fc1, w_fc2, vec)

    out = out.reshape(Npad, T, D)
    return out[:N] if Npad != N else out


# ----------------------------------------------------------------------------- pure-JAX reference
def _reference_forward(params, x, mask, cfg):
    """Pure-JAX mirror of the PyTorch module (eval mode) — correctness check only."""
    N, T, D = x.shape
    H, BS = cfg.n_heads, cfg.block_size
    TP = T // BS
    scale = math.sqrt(D // H)

    def heads(t):
        n, L, d = t.shape
        return t.reshape(n, L, H, d // H).transpose(0, 2, 1, 3)      # (N, H, L, dh)

    def attention(qi, ki, vi, wq, wk, wv, mask_q, mask_attn):
        qh, kh, vh = heads(qi @ wq), heads(ki @ wk), heads(vi @ wv)
        qh = qh * mask_q[:, None, :, None]
        s = jnp.einsum("nhqd,nhkd->nhqk", qh, kh) / scale
        s = s - 10000.0 * (1.0 - mask_attn[:, None, None, :])
        p = jax.nn.softmax(s, axis=-1)
        o = jnp.einsum("nhqk,nhkd->nhqd", p, vh)
        return o.transpose(0, 2, 1, 3).reshape(N, -1, D)

    xl = (x @ params["proj_lin_w"] + params["proj_lin_b"]) * mask[:, :, None]
    x_pool = xl.reshape(N, TP, BS, D).mean(axis=2)
    pmask = jnp.clip(mask.reshape(N, TP, BS).sum(-1), 0.0, 1.0)

    x_proj = attention(x_pool, x_pool, x_pool,
                       params["pa_wq"], params["pa_wk"], params["pa_wv"], pmask, pmask)
    h = attention(x, x_proj, x_proj,
                  params["oa_wq"], params["oa_wk"], params["oa_wv"], mask, pmask) + x

    def ln(z, g, b):
        u = z.mean(-1, keepdims=True)
        v = ((z - u) ** 2).mean(-1, keepdims=True)
        return g * (z - u) / jnp.sqrt(v + cfg.eps) + b

    h1 = ln(x + h @ params["tl_proj_w"] + params["tl_proj_b"], params["ln1_g"], params["ln1_b"])
    ff = h1 @ params["fc1_w"] + params["fc1_b"]
    ff = ff * 0.5 * (1.0 + jax.lax.erf(ff / math.sqrt(2.0)))
    ff = ff @ params["fc2_w"] + params["fc2_b"]
    return ln(h1 + ff, params["ln2_g"], params["ln2_b"])


# ----------------------------------------------------------------------------- params
def init_params(key, cfg):
    D, Da, Dff = cfg.hidden, cfg.hidden_attn, cfg.hidden_ff
    ks = jax.random.split(key, 12)

    def rnd(k, shape, s=0.05):
        return (s * jax.random.normal(k, shape)).astype(jnp.float32)

    return {
        # Projection.linear
        "proj_lin_w": rnd(ks[0], (D, D)), "proj_lin_b": rnd(ks[1], (D,)),
        # proj_attn (inner Attention, no bias)
        "pa_wq": rnd(ks[2], (D, Da)), "pa_wk": rnd(ks[3], (D, Da)), "pa_wv": rnd(ks[4], (D, D)),
        # output_attn (no bias)
        "oa_wq": rnd(ks[5], (D, Da)), "oa_wk": rnd(ks[6], (D, Da)), "oa_wv": rnd(ks[7], (D, D)),
        # TransformerLayer.proj
        "tl_proj_w": rnd(ks[8], (D, D)), "tl_proj_b": rnd(ks[9], (D,)),
        # CustomLayerNorms (torch init: ones / zeros)
        "ln1_g": jnp.ones((D,), jnp.float32), "ln1_b": jnp.zeros((D,), jnp.float32),
        "ln2_g": jnp.ones((D,), jnp.float32), "ln2_b": jnp.zeros((D,), jnp.float32),
        # PointWiseFeedForward
        "fc1_w": rnd(ks[10], (D, Dff)), "fc1_b": jnp.zeros((Dff,), jnp.float32),
        "fc2_w": rnd(ks[11], (Dff, D)), "fc2_b": jnp.zeros((D,), jnp.float32),
    }


# ----------------------------------------------------------------------------- main
if __name__ == "__main__":
    cfg = Cfg()
    key = jax.random.PRNGKey(0)
    pkey, xkey = jax.random.split(key)

    params = init_params(pkey, cfg)

    N, T, D = 2, 16, cfg.hidden
    x = jax.random.normal(xkey, (N, T, D), dtype=jnp.float32)
    lengths = jnp.array([16, 11])
    mask = (jnp.arange(T)[None, :] < lengths[:, None]).astype(jnp.float32)   # (N, T)

    @jax.jit
    def fwd(p, xx, mm):
        return transformer_layer_forward(p, xx, mm, cfg)

    out = jax.block_until_ready(fwd(params, x, mask))

    assert out.shape == (N, T, D)
    assert bool(jnp.all(jnp.isfinite(out)))

    # Sanity check vs. a pure-f32 pure-JAX reference.  The kernel feeds the MXU
    # bf16 operands (f32 accumulation) and uses an approximate EUP reciprocal in
    # the softmax, so compare with a correspondingly loose tolerance.
    with jax.default_matmul_precision("float32"):
        ref = _reference_forward(params, x, mask, cfg)
    assert bool(jnp.allclose(out, ref, atol=5e-2, rtol=5e-2)), \
        float(jnp.max(jnp.abs(out - ref)))

    print("KERNEL_OK")
</pallas_src>

<mosaic_0001>
module attributes {stable_mosaic.version = 11 : i64} {
  func.func @_fused_layer_kernel(%arg0: i32, %arg1: memref<1x32x32xf32, #tpu.memory_space<vmem>>, %arg2: memref<1x32x1xf32, #tpu.memory_space<vmem>>, %arg3: memref<8x32xf32, #tpu.memory_space<vmem>>, %arg4: memref<32x8xf32, #tpu.memory_space<vmem>>, %arg5: memref<32x64xbf16, #tpu.memory_space<vmem>>, %arg6: memref<32x96xbf16, #tpu.memory_space<vmem>>, %arg7: memref<32x64xbf16, #tpu.memory_space<vmem>>, %arg8: memref<32x32xbf16, #tpu.memory_space<vmem>>, %arg9: memref<32x64xbf16, #tpu.memory_space<vmem>>, %arg10: memref<64x32xbf16, #tpu.memory_space<vmem>>, %arg11: memref<8x64xf32, #tpu.memory_space<vmem>>, %arg12: memref<1x32x32xf32, #tpu.memory_space<vmem>>) attributes {dimension_semantics = [#tpu.dimension_semantics<parallel>], iteration_bounds = array<i64: 1>, scalar_prefetch = 0 : i64, scratch_operands = 0 : i64, tpu.core_type = #tpu.core_type<tc>, window_params = [{transform_indices = @transform_0, window_bounds = array<i64: 1, 32, 32>}, {transform_indices = @transform_1, window_bounds = array<i64: 1, 32, 1>}, {pipeline_mode = #tpu.pipeline_mode<synchronous>, transform_indices = @transform_2, window_bounds = array<i64: 8, 32>}, {pipeline_mode = #tpu.pipeline_mode<synchronous>, transform_indices = @transform_3, window_bounds = array<i64: 32, 8>}, {pipeline_mode = #tpu.pipeline_mode<synchronous>, transform_indices = @transform_4, window_bounds = array<i64: 32, 64>}, {pipeline_mode = #tpu.pipeline_mode<synchronous>, transform_indices = @transform_5, window_bounds = array<i64: 32, 96>}, {pipeline_mode = #tpu.pipeline_mode<synchronous>, transform_indices = @transform_6, window_bounds = array<i64: 32, 64>}, {pipeline_mode = #tpu.pipeline_mode<synchronous>, transform_indices = @transform_7, window_bounds = array<i64: 32, 32>}, {pipeline_mode = #tpu.pipeline_mode<synchronous>, transform_indices = @transform_8, window_bounds = array<i64: 32, 64>}, {pipeline_mode = #tpu.pipeline_mode<synchronous>, transform_indices = @transform_9, window_bounds = array<i64: 64, 32>}, {pipeline_mode = #tpu.pipeline_mode<synchronous>, transform_indices = @transform_10, window_bounds = array<i64: 8, 64>}, {transform_indices = @transform_11, window_bounds = array<i64: 1, 32, 32>}]} {
    %c0 = arith.constant 0 : index
    %c0_0 = arith.constant 0 : index
    %c0_1 = arith.constant 0 : index
    %0 = vector.load %arg1[%c0, %c0_0, %c0_1] : memref<1x32x32xf32, #tpu.memory_space<vmem>>, vector<1x32x32xf32>
    %1 = vector.shape_cast %0 : vector<1x32x32xf32> to vector<32x32xf32>
    %c0_2 = arith.constant 0 : index
    %c0_3 = arith.constant 0 : index
    %c0_4 = arith.constant 0 : index
    %2 = vector.load %arg2[%c0_2, %c0_3, %c0_4] : memref<1x32x1xf32, #tpu.memory_space<vmem>>, vector<1x32x1xf32>
    %3 = vector.shape_cast %2 : vector<1x32x1xf32> to vector<32x1xf32>
    %c0_5 = arith.constant 0 : index
    %c0_6 = arith.constant 0 : index
    %4 = vector.load %arg3[%c0_5, %c0_6] : memref<8x32xf32, #tpu.memory_space<vmem>>, vector<8x32xf32>
    %c0_7 = arith.constant 0 : index
    %c0_8 = arith.constant 0 : index
    %5 = vector.load %arg4[%c0_7, %c0_8] : memref<32x8xf32, #tpu.memory_space<vmem>>, vector<32x8xf32>
    %cst = arith.constant dense<0.000000e+00> : vector<8x1xf32>
    %6 = tpu.matmul %4, %3, %cst {dimension_numbers = #tpu.dot_dimension_numbers<[1], [0], [0], [1], [0, 0, 1, 1], [], []>} : vector<8x32xf32>, vector<32x1xf32>, vector<8x1xf32> -> vector<8x1xf32>
    %cst_9 = arith.constant 4.000000e+00 : f32
    %7 = vector.broadcast %cst_9 : f32 to vector<8x1xf32>
    %8 = arith.mulf %7, %6 : vector<8x1xf32>
    %cst_10 = arith.constant 1.000000e+00 : f32
    %9 = vector.broadcast %cst_10 : f32 to vector<8x1xf32>
    %10 = arith.minimumf %8, %9 : vector<8x1xf32>
    %11 = tpu.iota {dimensions = array<i32: 0>} : vector<8x8xi32>
    %12 = tpu.iota {dimensions = array<i32: 1>} : vector<8x8xi32>
    %13 = arith.cmpi eq, %11, %12 : vector<8x8xi32>
    %cst_11 = arith.constant 0.000000e+00 : f32
    %14 = vector.shape_cast %10 : vector<8x1xf32> to vector<8x1xf32>
    %15 = vector.broadcast %14 : vector<8x1xf32> to vector<8x8xf32>
    %16 = vector.broadcast %cst_11 : f32 to vector<8x8xf32>
    %17 = arith.select %13, %15, %16 : vector<8x8xi1>, vector<8x8xf32>
    %cst_12 = arith.constant dense<0.000000e+00> : vector<32x8xf32>
    %18 = tpu.matmul %5, %17, %cst_12 {dimension_numbers = #tpu.dot_dimension_numbers<[1], [0], [0], [1], [0, 0, 1, 1], [], []>} : vector<32x8xf32>, vector<8x8xf32>, vector<32x8xf32> -> vector<32x8xf32>
    %cst_13 = arith.constant dense<0.000000e+00> : vector<8x8xf32>
    %19 = tpu.matmul %4, %18, %cst_13 {dimension_numbers = #tpu.dot_dimension_numbers<[1], [0], [0], [1], [0, 0, 1, 1], [], []>} : vector<8x32xf32>, vector<32x8xf32>, vector<8x8xf32> -> vector<8x8xf32>
    %cst_14 = arith.constant 1.000000e+00 : f32
    %20 = vector.broadcast %cst_14 : f32 to vector<32x8xf32>
    %21 = arith.subf %20, %18 : vector<32x8xf32>
    %cst_15 = arith.constant -1.000000e+04 : f32
    %22 = vector.broadcast %cst_15 : f32 to vector<32x8xf32>
    %23 = arith.mulf %22, %21 : vector<32x8xf32>
    %cst_16 = arith.constant 1.000000e+00 : f32
    %24 = vector.broadcast %cst_16 : f32 to vector<8x8xf32>
    %25 = arith.subf %24, %19 : vector<8x8xf32>
    %cst_17 = arith.constant -1.000000e+04 : f32
    %26 = vector.broadcast %cst_17 : f32 to vector<8x8xf32>
    %27 = arith.mulf %26, %25 : vector<8x8xf32>
    %28 = arith.truncf %1 : vector<32x32xf32> to vector<32x32xbf16>
    %c0_18 = arith.constant 0 : index
    %c0_19 = arith.constant 0 : index
    %29 = vector.load %arg5[%c0_18, %c0_19] : memref<32x64xbf16, #tpu.memory_space<vmem>>, vector<32x64xbf16>
    %cst_20 = arith.constant dense<0.000000e+00> : vector<32x64xf32>
    %30 = tpu.matmul %28, %29, %cst_20 {dimension_numbers = #tpu.dot_dimension_numbers<[1], [0], [0], [1], [0, 0, 1, 1], [], []>} : vector<32x32xbf16>, vector<32x64xbf16>, vector<32x64xf32> -> vector<32x64xf32>
    %31 = vector.extract_strided_slice %30 {offsets = [0, 0], sizes = [32, 32], strides = [1, 1]} : vector<32x64xf32> to vector<32x32xf32>
    %c0_21 = arith.constant 0 : index
    %c0_22 = arith.constant 0 : index
    %32 = vector.load %arg11[%c0_21, %c0_22] : memref<8x64xf32, #tpu.memory_space<vmem>>, vector<1x32xf32>
    %33 = vector.broadcast %32 : vector<1x32xf32> to vector<32x32xf32>
    %34 = arith.addf %31, %33 : vector<32x32xf32>
    %35 = vector.broadcast %3 : vector<32x1xf32> to vector<32x32xf32>
    %36 = arith.mulf %34, %35 : vector<32x32xf32>
    %37 = vector.extract_strided_slice %30 {offsets = [0, 32], sizes = [32, 32], strides = [1, 1]} : vector<32x64xf32> to vector<32x32xf32>
    %cst_23 = arith.constant 0.353553385 : f32
    %38 = vector.broadcast %cst_23 : f32 to vector<32x1xf32>
    %39 = arith.mulf %3, %38 : vector<32x1xf32>
    %40 = vector.broadcast %39 : vector<32x1xf32> to vector<32x32xf32>
    %41 = arith.mulf %37, %40 : vector<32x32xf32>
    %cst_24 = arith.constant dense<0.000000e+00> : vector<8x32xf32>
    %42 = tpu.matmul %4, %36, %cst_24 {dimension_numbers = #tpu.dot_dimension_numbers<[1], [0], [0], [1], [0, 0, 1, 1], [], []>} : vector<8x32xf32>, vector<32x32xf32>, vector<8x32xf32> -> vector<8x32xf32>
    %43 = arith.truncf %42 : vector<8x32xf32> to vector<8x32xbf16>
    %c0_25 = arith.constant 0 : index
    %c0_26 = arith.constant 0 : index
    %44 = vector.load %arg6[%c0_25, %c0_26] : memref<32x96xbf16, #tpu.memory_space<vmem>>, vector<32x96xbf16>
    %cst_27 = arith.constant dense<0.000000e+00> : vector<8x96xf32>
    %45 = tpu.matmul %43, %44, %cst_27 {dimension_numbers = #tpu.dot_dimension_numbers<[1], [0], [0], [1], [0, 0, 1, 1], [], []>} : vector<8x32xbf16>, vector<32x96xbf16>, vector<8x96xf32> -> vector<8x96xf32>
    %46 = vector.extract_strided_slice %45 {offsets = [0, 0], sizes = [8, 32], strides = [1, 1]} : vector<8x96xf32> to vector<8x32xf32>
    %cst_28 = arith.constant 0.353553385 : f32
    %47 = vector.broadcast %cst_28 : f32 to vector<8x1xf32>
    %48 = arith.mulf %10, %47 : vector<8x1xf32>
    %49 = vector.broadcast %48 : vector<8x1xf32> to vector<8x32xf32>
    %50 = arith.mulf %46, %49 : vector<8x32xf32>
    %51 = vector.extract_strided_slice %45 {offsets = [0, 32], sizes = [8, 32], strides = [1, 1]} : vector<8x96xf32> to vector<8x32xf32>
    %52 = vector.extract_strided_slice %45 {offsets = [0, 64], sizes = [8, 32], strides = [1, 1]} : vector<8x96xf32> to vector<8x32xf32>
    %53 = arith.truncf %50 : vector<8x32xf32> to vector<8x32xbf16>
    %54 = arith.truncf %51 : vector<8x32xf32> to vector<8x32xbf16>
    %55 = arith.truncf %52 : vector<8x32xf32> to vector<8x32xbf16>
    %56 = vector.extract_strided_slice %53 {offsets = [0, 0], sizes = [8, 8], strides = [1, 1]} : vector<8x32xbf16> to vector<8x8xbf16>
    %57 = vector.extract_strided_slice %54 {offsets = [0, 0], sizes = [8, 8], strides = [1, 1]} : vector<8x32xbf16> to vector<8x8xbf16>
    %58 = vector.extract_strided_slice %55 {offsets = [0, 0], sizes = [8, 8], strides = [1, 1]} : vector<8x32xbf16> to vector<8x8xbf16>
    "tpu.trace_start"() <{level = 10 : i32, message = "qd,kd->qk"}> : () -> ()
    %cst_29 = arith.constant dense<0.000000e+00> : vector<8x8xf32>
    %59 = tpu.matmul %56, %57, %cst_29 {dimension_numbers = #tpu.dot_dimension_numbers<[1], [1], [0], [0], [0, 0, 1, 0], [], []>} : vector<8x8xbf16>, vector<8x8xbf16>, vector<8x8xf32> -> vector<8x8xf32>
    "tpu.trace_stop"() : () -> ()
    %60 = arith.addf %59, %27 : vector<8x8xf32>
    %cst_30 = arith.constant dense<0xFF800000> : vector<8xf32>
    %61 = vector.multi_reduction <maximumf>, %60, %cst_30 [1] : vector<8x8xf32> to vector<8xf32>
    %62 = vector.shape_cast %61 : vector<8xf32> to vector<8x1xf32>
    %63 = vector.broadcast %62 : vector<8x1xf32> to vector<8x8xf32>
    %64 = arith.subf %60, %63 : vector<8x8xf32>
    %65 = math.exp %64 : vector<8x8xf32>
    %cst_31 = arith.constant dense<0.000000e+00> : vector<8xf32>
    %66 = vector.multi_reduction <add>, %65, %cst_31 [1] : vector<8x8xf32> to vector<8xf32>
    %67 = vector.shape_cast %66 : vector<8xf32> to vector<8x1xf32>
    %68 = tpu.reciprocal %67 {approx = true} : vector<8x1xf32> -> vector<8x1xf32>
    %69 = vector.broadcast %68 : vector<8x1xf32> to vector<8x8xf32>
    %70 = arith.mulf %65, %69 : vector<8x8xf32>
    %71 = arith.truncf %70 : vector<8x8xf32> to vector<8x8xbf16>
    %cst_32 = arith.constant dense<0.000000e+00> : vector<8x8xf32>
    %72 = tpu.matmul %71, %58, %cst_32 {dimension_numbers = #tpu.dot_dimension_numbers<[1], [0], [0], [1], [0, 0, 1, 1], [], []>} : vector<8x8xbf16>, vector<8x8xbf16>, vector<8x8xf32> -> vector<8x8xf32>
    %73 = vector.extract_strided_slice %53 {offsets = [0, 8], sizes = [8, 8], strides = [1, 1]} : vector<8x32xbf16> to vector<8x8xbf16>
    %74 = vector.extract_strided_slice %54 {offsets = [0, 8], sizes = [8, 8], strides = [1, 1]} : vector<8x32xbf16> to vector<8x8xbf16>
    %75 = vector.extract_strided_slice %55 {offsets = [0, 8], sizes = [8, 8], strides = [1, 1]} : vector<8x32xbf16> to vector<8x8xbf16>
    "tpu.trace_start"() <{level = 10 : i32, message = "qd,kd->qk"}> : () -> ()
    %cst_33 = arith.constant dense<0.000000e+00> : vector<8x8xf32>
    %76 = tpu.matmul %73, %74, %cst_33 {dimension_numbers = #tpu.dot_dimension_numbers<[1], [1], [0], [0], [0, 0, 1, 0], [], []>} : vector<8x8xbf16>, vector<8x8xbf16>, vector<8x8xf32> -> vector<8x8xf32>
    "tpu.trace_stop"() : () -> ()
    %77 = arith.addf %76, %27 : vector<8x8xf32>
    %cst_34 = arith.constant dense<0xFF800000> : vector<8xf32>
    %78 = vector.multi_reduction <maximumf>, %77, %cst_34 [1] : vector<8x8xf32> to vector<8xf32>
    %79 = vector.shape_cast %78 : vector<8xf32> to vector<8x1xf32>
    %80 = vector.broadcast %79 : vector<8x1xf32> to vector<8x8xf32>
    %81 = arith.subf %77, %80 : vector<8x8xf32>
    %82 = math.exp %81 : vector<8x8xf32>
    %cst_35 = arith.constant dense<0.000000e+00> : vector<8xf32>
    %83 = vector.multi_reduction <add>, %82, %cst_35 [1] : vector<8x8xf32> to vector<8xf32>
    %84 = vector.shape_cast %83 : vector<8xf32> to vector<8x1xf32>
    %85 = tpu.reciprocal %84 {approx = true} : vector<8x1xf32> -> vector<8x1xf32>
    %86 = vector.broadcast %85 : vector<8x1xf32> to vector<8x8xf32>
    %87 = arith.mulf %82, %86 : vector<8x8xf32>
    %88 = arith.truncf %87 : vector<8x8xf32> to vector<8x8xbf16>
    %cst_36 = arith.constant dense<0.000000e+00> : vector<8x8xf32>
    %89 = tpu.matmul %88, %75, %cst_36 {dimension_numbers = #tpu.dot_dimension_numbers<[1], [0], [0], [1], [0, 0, 1, 1], [], []>} : vector<8x8xbf16>, vector<8x8xbf16>, vector<8x8xf32> -> vector<8x8xf32>
    %90 = vector.extract_strided_slice %53 {offsets = [0, 16], sizes = [8, 8], strides = [1, 1]} : vector<8x32xbf16> to vector<8x8xbf16>
    %91 = vector.extract_strided_slice %54 {offsets = [0, 16], sizes = [8, 8], strides = [1, 1]} : vector<8x32xbf16> to vector<8x8xbf16>
    %92 = vector.extract_strided_slice %55 {offsets = [0, 16], sizes = [8, 8], strides = [1, 1]} : vector<8x32xbf16> to vector<8x8xbf16>
    "tpu.trace_start"() <{level = 10 : i32, message = "qd,kd->qk"}> : () -> ()
    %cst_37 = arith.constant dense<0.000000e+00> : vector<8x8xf32>
    %93 = tpu.matmul %90, %91, %cst_37 {dimension_numbers = #tpu.dot_dimension_numbers<[1], [1], [0], [0], [0, 0, 1, 0], [], []>} : vector<8x8xbf16>, vector<8x8xbf16>, vector<8x8xf32> -> vector<8x8xf32>
    "tpu.trace_stop"() : () -> ()
    %94 = arith.addf %93, %27 : vector<8x8xf32>
    %cst_38 = arith.constant dense<0xFF800000> : vector<8xf32>
    %95 = vector.multi_reduction <maximumf>, %94, %cst_38 [1] : vector<8x8xf32> to vector<8xf32>
    %96 = vector.shape_cast %95 : vector<8xf32> to vector<8x1xf32>
    %97 = vector.broadcast %96 : vector<8x1xf32> to vector<8x8xf32>
    %98 = arith.subf %94, %97 : vector<8x8xf32>
    %99 = math.exp %98 : vector<8x8xf32>
    %cst_39 = arith.constant dense<0.000000e+00> : vector<8xf32>
    %100 = vector.multi_reduction <add>, %99, %cst_39 [1] : vector<8x8xf32> to vector<8xf32>
    %101 = vector.shape_cast %100 : vector<8xf32> to vector<8x1xf32>
    %102 = tpu.reciprocal %101 {approx = true} : vector<8x1xf32> -> vector<8x1xf32>
    %103 = vector.broadcast %102 : vector<8x1xf32> to vector<8x8xf32>
    %104 = arith.mulf %99, %103 : vector<8x8xf32>
    %105 = arith.truncf %104 : vector<8x8xf32> to vector<8x8xbf16>
    %cst_40 = arith.constant dense<0.000000e+00> : vector<8x8xf32>
    %106 = tpu.matmul %105, %92, %cst_40 {dimension_numbers = #tpu.dot_dimension_numbers<[1], [0], [0], [1], [0, 0, 1, 1], [], []>} : vector<8x8xbf16>, vector<8x8xbf16>, vector<8x8xf32> -> vector<8x8xf32>
    %107 = vector.extract_strided_slice %53 {offsets = [0, 24], sizes = [8, 8], strides = [1, 1]} : vector<8x32xbf16> to vector<8x8xbf16>
    %108 = vector.extract_strided_slice %54 {offsets = [0, 24], sizes = [8, 8], strides = [1, 1]} : vector<8x32xbf16> to vector<8x8xbf16>
    %109 = vector.extract_strided_slice %55 {offsets = [0, 24], sizes = [8, 8], strides = [1, 1]} : vector<8x32xbf16> to vector<8x8xbf16>
    "tpu.trace_start"() <{level = 10 : i32, message = "qd,kd->qk"}> : () -> ()
    %cst_41 = arith.constant dense<0.000000e+00> : vector<8x8xf32>
    %110 = tpu.matmul %107, %108, %cst_41 {dimension_numbers = #tpu.dot_dimension_numbers<[1], [1], [0], [0], [0, 0, 1, 0], [], []>} : vector<8x8xbf16>, vector<8x8xbf16>, vector<8x8xf32> -> vector<8x8xf32>
    "tpu.trace_stop"() : () -> ()
    %111 = arith.addf %110, %27 : vector<8x8xf32>
    %cst_42 = arith.constant dense<0xFF800000> : vector<8xf32>
    %112 = vector.multi_reduction <maximumf>, %111, %cst_42 [1] : vector<8x8xf32> to vector<8xf32>
    %113 = vector.shape_cast %112 : vector<8xf32> to vector<8x1xf32>
    %114 = vector.broadcast %113 : vector<8x1xf32> to vector<8x8xf32>
    %115 = arith.subf %111, %114 : vector<8x8xf32>
    %116 = math.exp %115 : vector<8x8xf32>
    %cst_43 = arith.constant dense<0.000000e+00> : vector<8xf32>
    %117 = vector.multi_reduction <add>, %116, %cst_43 [1] : vector<8x8xf32> to vector<8xf32>
    %118 = vector.shape_cast %117 : vector<8xf32> to vector<8x1xf32>
    %119 = tpu.reciprocal %118 {approx = true} : vector<8x1xf32> -> vector<8x1xf32>
    %120 = vector.broadcast %119 : vector<8x1xf32> to vector<8x8xf32>
    %121 = arith.mulf %116, %120 : vector<8x8xf32>
    %122 = arith.truncf %121 : vector<8x8xf32> to vector<8x8xbf16>
    %cst_44 = arith.constant dense<0.000000e+00> : vector<8x8xf32>
    %123 = tpu.matmul %122, %109, %cst_44 {dimension_numbers = #tpu.dot_dimension_numbers<[1], [0], [0], [1], [0, 0, 1, 1], [], []>} : vector<8x8xbf16>, vector<8x8xbf16>, vector<8x8xf32> -> vector<8x8xf32>
    %124 = tpu.concatenate %72, %89, %106, %123 in 1 : vector<8x8xf32>, vector<8x8xf32>, vector<8x8xf32>, vector<8x8xf32> -> vector<8x32xf32>
    %125 = arith.truncf %124 : vector<8x32xf32> to vector<8x32xbf16>
    %c0_45 = arith.constant 0 : index
    %c0_46 = arith.constant 0 : index
    %126 = vector.load %arg7[%c0_45, %c0_46] : memref<32x64xbf16, #tpu.memory_space<vmem>>, vector<32x64xbf16>
    %cst_47 = arith.constant dense<0.000000e+00> : vector<8x64xf32>
    %127 = tpu.matmul %125, %126, %cst_47 {dimension_numbers = #tpu.dot_dimension_numbers<[1], [0], [0], [1], [0, 0, 1, 1], [], []>} : vector<8x32xbf16>, vector<32x64xbf16>, vector<8x64xf32> -> vector<8x64xf32>
    %128 = vector.extract_strided_slice %127 {offsets = [0, 0], sizes = [8, 32], strides = [1, 1]} : vector<8x64xf32> to vector<8x32xf32>
    %129 = vector.extract_strided_slice %127 {offsets = [0, 32], sizes = [8, 32], strides = [1, 1]} : vector<8x64xf32> to vector<8x32xf32>
    %130 = arith.truncf %41 : vector<32x32xf32> to vector<32x32xbf16>
    %131 = arith.truncf %128 : vector<8x32xf32> to vector<8x32xbf16>
    %132 = arith.truncf %129 : vector<8x32xf32> to vector<8x32xbf16>
    %133 = vector.extract_strided_slice %130 {offsets = [0, 0], sizes = [32, 8], strides = [1, 1]} : vector<32x32xbf16> to vector<32x8xbf16>
    %134 = vector.extract_strided_slice %131 {offsets = [0, 0], sizes = [8, 8], strides = [1, 1]} : vector<8x32xbf16> to vector<8x8xbf16>
    %135 = vector.extract_strided_slice %132 {offsets = [0, 0], sizes = [8, 8], strides = [1, 1]} : vector<8x32xbf16> to vector<8x8xbf16>
    "tpu.trace_start"() <{level = 10 : i32, message = "qd,kd->qk"}> : () -> ()
    %cst_48 = arith.constant dense<0.000000e+00> : vector<32x8xf32>
    %136 = tpu.matmul %133, %134, %cst_48 {dimension_numbers = #tpu.dot_dimension_numbers<[1], [1], [0], [0], [0, 0, 1, 0], [], []>} : vector<32x8xbf16>, vector<8x8xbf16>, vector<32x8xf32> -> vector<32x8xf32>
    "tpu.trace_stop"() : () -> ()
    %137 = arith.addf %136, %23 : vector<32x8xf32>
    %cst_49 = arith.constant dense<0xFF800000> : vector<32xf32>
    %138 = vector.multi_reduction <maximumf>, %137, %cst_49 [1] : vector<32x8xf32> to vector<32xf32>
    %139 = vector.shape_cast %138 : vector<32xf32> to vector<32x1xf32>
    %140 = vector.broadcast %139 : vector<32x1xf32> to vector<32x8xf32>
    %141 = arith.subf %137, %140 : vector<32x8xf32>
    %142 = math.exp %141 : vector<32x8xf32>
    %cst_50 = arith.constant dense<0.000000e+00> : vector<32xf32>
    %143 = vector.multi_reduction <add>, %142, %cst_50 [1] : vector<32x8xf32> to vector<32xf32>
    %144 = vector.shape_cast %143 : vector<32xf32> to vector<32x1xf32>
    %145 = tpu.reciprocal %144 {approx = true} : vector<32x1xf32> -> vector<32x1xf32>
    %146 = vector.broadcast %145 : vector<32x1xf32> to vector<32x8xf32>
    %147 = arith.mulf %142, %146 : vector<32x8xf32>
    %148 = arith.truncf %147 : vector<32x8xf32> to vector<32x8xbf16>
    %cst_51 = arith.constant dense<0.000000e+00> : vector<32x8xf32>
    %149 = tpu.matmul %148, %135, %cst_51 {dimension_numbers = #tpu.dot_dimension_numbers<[1], [0], [0], [1], [0, 0, 1, 1], [], []>} : vector<32x8xbf16>, vector<8x8xbf16>, vector<32x8xf32> -> vector<32x8xf32>
    %150 = vector.extract_strided_slice %130 {offsets = [0, 8], sizes = [32, 8], strides = [1, 1]} : vector<32x32xbf16> to vector<32x8xbf16>
    %151 = vector.extract_strided_slice %131 {offsets = [0, 8], sizes = [8, 8], strides = [1, 1]} : vector<8x32xbf16> to vector<8x8xbf16>
    %152 = vector.extract_strided_slice %132 {offsets = [0, 8], sizes = [8, 8], strides = [1, 1]} : vector<8x32xbf16> to vector<8x8xbf16>
    "tpu.trace_start"() <{level = 10 : i32, message = "qd,kd->qk"}> : () -> ()
    %cst_52 = arith.constant dense<0.000000e+00> : vector<32x8xf32>
    %153 = tpu.matmul %150, %151, %cst_52 {dimension_numbers = #tpu.dot_dimension_numbers<[1], [1], [0], [0], [0, 0, 1, 0], [], []>} : vector<32x8xbf16>, vector<8x8xbf16>, vector<32x8xf32> -> vector<32x8xf32>
    "tpu.trace_stop"() : () -> ()
    %154 = arith.addf %153, %23 : vector<32x8xf32>
    %cst_53 = arith.constant dense<0xFF800000> : vector<32xf32>
    %155 = vector.multi_reduction <maximumf>, %154, %cst_53 [1] : vector<32x8xf32> to vector<32xf32>
    %156 = vector.shape_cast %155 : vector<32xf32> to vector<32x1xf32>
    %157 = vector.broadcast %156 : vector<32x1xf32> to vector<32x8xf32>
    %158 = arith.subf %154, %157 : vector<32x8xf32>
    %159 = math.exp %158 : vector<32x8xf32>
    %cst_54 = arith.constant dense<0.000000e+00> : vector<32xf32>
    %160 = vector.multi_reduction <add>, %159, %cst_54 [1] : vector<32x8xf32> to vector<32xf32>
    %161 = vector.shape_cast %160 : vector<32xf32> to vector<32x1xf32>
    %162 = tpu.reciprocal %161 {approx = true} : vector<32x1xf32> -> vector<32x1xf32>
    %163 = vector.broadcast %162 : vector<32x1xf32> to vector<32x8xf32>
    %164 = arith.mulf %159, %163 : vector<32x8xf32>
    %165 = arith.truncf %164 : vector<32x8xf32> to vector<32x8xbf16>
    %cst_55 = arith.constant dense<0.000000e+00> : vector<32x8xf32>
    %166 = tpu.matmul %165, %152, %cst_55 {dimension_numbers = #tpu.dot_dimension_numbers<[1], [0], [0], [1], [0, 0, 1, 1], [], []>} : vector<32x8xbf16>, vector<8x8xbf16>, vector<32x8xf32> -> vector<32x8xf32>
    %167 = vector.extract_strided_slice %130 {offsets = [0, 16], sizes = [32, 8], strides = [1, 1]} : vector<32x32xbf16> to vector<32x8xbf16>
    %168 = vector.extract_strided_slice %131 {offsets = [0, 16], sizes = [8, 8], strides = [1, 1]} : vector<8x32xbf16> to vector<8x8xbf16>
    %169 = vector.extract_strided_slice %132 {offsets = [0, 16], sizes = [8, 8], strides = [1, 1]} : vector<8x32xbf16> to vector<8x8xbf16>
    "tpu.trace_start"() <{level = 10 : i32, message = "qd,kd->qk"}> : () -> ()
    %cst_56 = arith.constant dense<0.000000e+00> : vector<32x8xf32>
    %170 = tpu.matmul %167, %168, %cst_56 {dimension_numbers = #tpu.dot_dimension_numbers<[1], [1], [0], [0], [0, 0, 1, 0], [], []>} : vector<32x8xbf16>, vector<8x8xbf16>, vector<32x8xf32> -> vector<32x8xf32>
    "tpu.trace_stop"() : () -> ()
    %171 = arith.addf %170, %23 : vector<32x8xf32>
    %cst_57 = arith.constant dense<0xFF800000> : vector<32xf32>
    %172 = vector.multi_reduction <maximumf>, %171, %cst_57 [1] : vector<32x8xf32> to vector<32xf32>
    %173 = vector.shape_cast %172 : vector<32xf32> to vector<32x1xf32>
    %174 = vector.broadcast %173 : vector<32x1xf32> to vector<32x8xf32>
    %175 = arith.subf %171, %174 : vector<32x8xf32>
    %176 = math.exp %175 : vector<32x8xf32>
    %cst_58 = arith.constant dense<0.000000e+00> : vector<32xf32>
    %177 = vector.multi_reduction <add>, %176, %cst_58 [1] : vector<32x8xf32> to vector<32xf32>
    %178 = vector.shape_cast %177 : vector<32xf32> to vector<32x1xf32>
    %179 = tpu.reciprocal %178 {approx = true} : vector<32x1xf32> -> vector<32x1xf32>
    %180 = vector.broadcast %179 : vector<32x1xf32> to vector<32x8xf32>
    %181 = arith.mulf %176, %180 : vector<32x8xf32>
    %182 = arith.truncf %181 : vector<32x8xf32> to vector<32x8xbf16>
    %cst_59 = arith.constant dense<0.000000e+00> : vector<32x8xf32>
    %183 = tpu.matmul %182, %169, %cst_59 {dimension_numbers = #tpu.dot_dimension_numbers<[1], [0], [0], [1], [0, 0, 1, 1], [], []>} : vector<32x8xbf16>, vector<8x8xbf16>, vector<32x8xf32> -> vector<32x8xf32>
    %184 = vector.extract_strided_slice %130 {offsets = [0, 24], sizes = [32, 8], strides = [1, 1]} : vector<32x32xbf16> to vector<32x8xbf16>
    %185 = vector.extract_strided_slice %131 {offsets = [0, 24], sizes = [8, 8], strides = [1, 1]} : vector<8x32xbf16> to vector<8x8xbf16>
    %186 = vector.extract_strided_slice %132 {offsets = [0, 24], sizes = [8, 8], strides = [1, 1]} : vector<8x32xbf16> to vector<8x8xbf16>
    "tpu.trace_start"() <{level = 10 : i32, message = "qd,kd->qk"}> : () -> ()
    %cst_60 = arith.constant dense<0.000000e+00> : vector<32x8xf32>
    %187 = tpu.matmul %184, %185, %cst_60 {dimension_numbers = #tpu.dot_dimension_numbers<[1], [1], [0], [0], [0, 0, 1, 0], [], []>} : vector<32x8xbf16>, vector<8x8xbf16>, vector<32x8xf32> -> vector<32x8xf32>
    "tpu.trace_stop"() : () -> ()
    %188 = arith.addf %187, %23 : vector<32x8xf32>
    %cst_61 = arith.constant dense<0xFF800000> : vector<32xf32>
    %189 = vector.multi_reduction <maximumf>, %188, %cst_61 [1] : vector<32x8xf32> to vector<32xf32>
    %190 = vector.shape_cast %189 : vector<32xf32> to vector<32x1xf32>
    %191 = vector.broadcast %190 : vector<32x1xf32> to vector<32x8xf32>
    %192 = arith.subf %188, %191 : vector<32x8xf32>
    %193 = math.exp %192 : vector<32x8xf32>
    %cst_62 = arith.constant dense<0.000000e+00> : vector<32xf32>
    %194 = vector.multi_reduction <add>, %193, %cst_62 [1] : vector<32x8xf32> to vector<32xf32>
    %195 = vector.shape_cast %194 : vector<32xf32> to vector<32x1xf32>
    %196 = tpu.reciprocal %195 {approx = true} : vector<32x1xf32> -> vector<32x1xf32>
    %197 = vector.broadcast %196 : vector<32x1xf32> to vector<32x8xf32>
    %198 = arith.mulf %193, %197 : vector<32x8xf32>
    %199 = arith.truncf %198 : vector<32x8xf32> to vector<32x8xbf16>
    %cst_63 = arith.constant dense<0.000000e+00> : vector<32x8xf32>
    %200 = tpu.matmul %199, %186, %cst_63 {dimension_numbers = #tpu.dot_dimension_numbers<[1], [0], [0], [1], [0, 0, 1, 1], [], []>} : vector<32x8xbf16>, vector<8x8xbf16>, vector<32x8xf32> -> vector<32x8xf32>
    %201 = tpu.concatenate %149, %166, %183, %200 in 1 : vector<32x8xf32>, vector<32x8xf32>, vector<32x8xf32>, vector<32x8xf32> -> vector<32x32xf32>
    %202 = arith.addf %201, %1 : vector<32x32xf32>
    %203 = arith.truncf %202 : vector<32x32xf32> to vector<32x32xbf16>
    %c0_64 = arith.constant 0 : index
    %c0_65 = arith.constant 0 : index
    %204 = vector.load %arg8[%c0_64, %c0_65] : memref<32x32xbf16, #tpu.memory_space<vmem>>, vector<32x32xbf16>
    %cst_66 = arith.constant dense<0.000000e+00> : vector<32x32xf32>
    %205 = tpu.matmul %203, %204, %cst_66 {dimension_numbers = #tpu.dot_dimension_numbers<[1], [0], [0], [1], [0, 0, 1, 1], [], []>} : vector<32x32xbf16>, vector<32x32xbf16>, vector<32x32xf32> -> vector<32x32xf32>
    %c1 = arith.constant 1 : index
    %c0_67 = arith.constant 0 : index
    %206 = vector.load %arg11[%c1, %c0_67] : memref<8x64xf32, #tpu.memory_space<vmem>>, vector<1x32xf32>
    %207 = vector.broadcast %206 : vector<1x32xf32> to vector<32x32xf32>
    %208 = arith.addf %205, %207 : vector<32x32xf32>
    %209 = arith.addf %1, %208 : vector<32x32xf32>
    %c2 = arith.constant 2 : index
    %c0_68 = arith.constant 0 : index
    %210 = vector.load %arg11[%c2, %c0_68] : memref<8x64xf32, #tpu.memory_space<vmem>>, vector<1x32xf32>
    %c3 = arith.constant 3 : index
    %c0_69 = arith.constant 0 : index
    %211 = vector.load %arg11[%c3, %c0_69] : memref<8x64xf32, #tpu.memory_space<vmem>>, vector<1x32xf32>
    %cst_70 = arith.constant dense<0.000000e+00> : vector<32xf32>
    %212 = vector.multi_reduction <add>, %209, %cst_70 [1] : vector<32x32xf32> to vector<32xf32>
    %213 = vector.shape_cast %212 : vector<32xf32> to vector<32x1xf32>
    %cst_71 = arith.constant 3.200000e+01 : f32
    %214 = vector.broadcast %cst_71 : f32 to vector<32x1xf32>
    %215 = arith.divf %213, %214 : vector<32x1xf32>
    %216 = vector.broadcast %215 : vector<32x1xf32> to vector<32x32xf32>
    %217 = arith.subf %209, %216 : vector<32x32xf32>
    %218 = arith.mulf %217, %217 : vector<32x32xf32>
    %cst_72 = arith.constant dense<0.000000e+00> : vector<32xf32>
    %219 = vector.multi_reduction <add>, %218, %cst_72 [1] : vector<32x32xf32> to vector<32xf32>
    %220 = vector.shape_cast %219 : vector<32xf32> to vector<32x1xf32>
    %cst_73 = arith.constant 3.200000e+01 : f32
    %221 = vector.broadcast %cst_73 : f32 to vector<32x1xf32>
    %222 = arith.divf %220, %221 : vector<32x1xf32>
    %cst_74 = arith.constant 9.99999996E-13 : f32
    %223 = vector.broadcast %cst_74 : f32 to vector<32x1xf32>
    %224 = arith.addf %222, %223 : vector<32x1xf32>
    %225 = math.rsqrt %224 : vector<32x1xf32>
    %226 = vector.broadcast %225 : vector<32x1xf32> to vector<32x32xf32>
    %227 = arith.mulf %217, %226 : vector<32x32xf32>
    %228 = vector.broadcast %210 : vector<1x32xf32> to vector<32x32xf32>
    %229 = arith.mulf %228, %227 : vector<32x32xf32>
    %230 = vector.broadcast %211 : vector<1x32xf32> to vector<32x32xf32>
    %231 = arith.addf %229, %230 : vector<32x32xf32>
    %232 = arith.truncf %231 : vector<32x32xf32> to vector<32x32xbf16>
    %c0_75 = arith.constant 0 : index
    %c0_76 = arith.constant 0 : index
    %233 = vector.load %arg9[%c0_75, %c0_76] : memref<32x64xbf16, #tpu.memory_space<vmem>>, vector<32x64xbf16>
    %cst_77 = arith.constant dense<0.000000e+00> : vector<32x64xf32>
    %234 = tpu.matmul %232, %233, %cst_77 {dimension_numbers = #tpu.dot_dimension_numbers<[1], [0], [0], [1], [0, 0, 1, 1], [], []>} : vector<32x32xbf16>, vector<32x64xbf16>, vector<32x64xf32> -> vector<32x64xf32>
    %c4 = arith.constant 4 : index
    %c0_78 = arith.constant 0 : index
    %235 = vector.load %arg11[%c4, %c0_78] : memref<8x64xf32, #tpu.memory_space<vmem>>, vector<1x64xf32>
    %236 = vector.broadcast %235 : vector<1x64xf32> to vector<32x64xf32>
    %237 = arith.addf %234, %236 : vector<32x64xf32>
    %cst_79 = arith.constant 5.000000e-01 : f32
    %238 = vector.broadcast %cst_79 : f32 to vector<32x64xf32>
    %239 = arith.mulf %237, %238 : vector<32x64xf32>
    %cst_80 = arith.constant 0.707106769 : f32
    %240 = vector.broadcast %cst_80 : f32 to vector<32x64xf32>
    %241 = arith.mulf %237, %240 : vector<32x64xf32>
    %242 = math.absf %241 : vector<32x64xf32>
    %cst_81 = arith.constant 0.327591091 : f32
    %243 = vector.broadcast %cst_81 : f32 to vector<32x64xf32>
    %244 = arith.mulf %243, %242 : vector<32x64xf32>
    %cst_82 = arith.constant 1.000000e+00 : f32
    %245 = vector.broadcast %cst_82 : f32 to vector<32x64xf32>
    %246 = arith.addf %245, %244 : vector<32x64xf32>
    %cst_83 = arith.constant 1.000000e+00 : f32
    %247 = vector.broadcast %cst_83 : f32 to vector<32x64xf32>
    %248 = arith.divf %247, %246 : vector<32x64xf32>
    %cst_84 = arith.constant 1.06140542 : f32
    %249 = vector.broadcast %cst_84 : f32 to vector<32x64xf32>
    %250 = arith.mulf %249, %248 : vector<32x64xf32>
    %cst_85 = arith.constant -1.45315206 : f32
    %251 = vector.broadcast %cst_85 : f32 to vector<32x64xf32>
    %252 = arith.addf %250, %251 : vector<32x64xf32>
    %253 = arith.mulf %252, %248 : vector<32x64xf32>
    %cst_86 = arith.constant 1.42141378 : f32
    %254 = vector.broadcast %cst_86 : f32 to vector<32x64xf32>
    %255 = arith.addf %253, %254 : vector<32x64xf32>
    %256 = arith.mulf %255, %248 : vector<32x64xf32>
    %cst_87 = arith.constant -0.284496725 : f32
    %257 = vector.broadcast %cst_87 : f32 to vector<32x64xf32>
    %258 = arith.addf %256, %257 : vector<32x64xf32>
    %259 = arith.mulf %258, %248 : vector<32x64xf32>
    %cst_88 = arith.constant 0.254829586 : f32
    %260 = vector.broadcast %cst_88 : f32 to vector<32x64xf32>
    %261 = arith.addf %259, %260 : vector<32x64xf32>
    %262 = arith.mulf %261, %248 : vector<32x64xf32>
    %263 = arith.mulf %242, %242 : vector<32x64xf32>
    %cst_89 = arith.constant 0.000000e+00 : f32
    %264 = vector.broadcast %cst_89 : f32 to vector<32x64xf32>
    %265 = arith.subf %264, %263 : vector<32x64xf32>
    %266 = math.exp %265 : vector<32x64xf32>
    %267 = arith.mulf %262, %266 : vector<32x64xf32>
    %cst_90 = arith.constant 1.000000e+00 : f32
    %268 = vector.broadcast %cst_90 : f32 to vector<32x64xf32>
    %269 = arith.subf %268, %267 : vector<32x64xf32>
    %cst_91 = arith.constant 0.000000e+00 : f32
    %270 = vector.broadcast %cst_91 : f32 to vector<32x64xf32>
    %271 = arith.cmpf olt, %241, %270 : vector<32x64xf32>
    %cst_92 = arith.constant 0.000000e+00 : f32
    %272 = vector.broadcast %cst_92 : f32 to vector<32x64xf32>
    %273 = arith.subf %272, %269 : vector<32x64xf32>
    %274 = arith.select %271, %273, %269 : vector<32x64xi1>, vector<32x64xf32>
    %cst_93 = arith.constant 1.000000e+00 : f32
    %275 = vector.broadcast %cst_93 : f32 to vector<32x64xf32>
    %276 = arith.addf %275, %274 : vector<32x64xf32>
    %277 = arith.mulf %239, %276 : vector<32x64xf32>
    %278 = arith.truncf %277 : vector<32x64xf32> to vector<32x64xbf16>
    %c0_94 = arith.constant 0 : index
    %c0_95 = arith.constant 0 : index
    %279 = vector.load %arg10[%c0_94, %c0_95] : memref<64x32xbf16, #tpu.memory_space<vmem>>, vector<64x32xbf16>
    %cst_96 = arith.constant dense<0.000000e+00> : vector<32x32xf32>
    %280 = tpu.matmul %278, %279, %cst_96 {dimension_numbers = #tpu.dot_dimension_numbers<[1], [0], [0], [1], [0, 0, 1, 1], [], []>} : vector<32x64xbf16>, vector<64x32xbf16>, vector<32x32xf32> -> vector<32x32xf32>
    %c5 = arith.constant 5 : index
    %c0_97 = arith.constant 0 : index
    %281 = vector.load %arg11[%c5, %c0_97] : memref<8x64xf32, #tpu.memory_space<vmem>>, vector<1x32xf32>
    %282 = vector.broadcast %281 : vector<1x32xf32> to vector<32x32xf32>
    %283 = arith.addf %280, %282 : vector<32x32xf32>
    %284 = arith.addf %231, %283 : vector<32x32xf32>
    %c6 = arith.constant 6 : index
    %c0_98 = arith.constant 0 : index
    %285 = vector.load %arg11[%c6, %c0_98] : memref<8x64xf32, #tpu.memory_space<vmem>>, vector<1x32xf32>
    %c7 = arith.constant 7 : index
    %c0_99 = arith.constant 0 : index
    %286 = vector.load %arg11[%c7, %c0_99] : memref<8x64xf32, #tpu.memory_space<vmem>>, vector<1x32xf32>
    %cst_100 = arith.constant dense<0.000000e+00> : vector<32xf32>
    %287 = vector.multi_reduction <add>, %284, %cst_100 [1] : vector<32x32xf32> to vector<32xf32>
    %288 = vector.shape_cast %287 : vector<32xf32> to vector<32x1xf32>
    %cst_101 = arith.constant 3.200000e+01 : f32
    %289 = vector.broadcast %cst_101 : f32 to vector<32x1xf32>
    %290 = arith.divf %288, %289 : vector<32x1xf32>
    %291 = vector.broadcast %290 : vector<32x1xf32> to vector<32x32xf32>
    %292 = arith.subf %284, %291 : vector<32x32xf32>
    %293 = arith.mulf %292, %292 : vector<32x32xf32>
    %cst_102 = arith.constant dense<0.000000e+00> : vector<32xf32>
    %294 = vector.multi_reduction <add>, %293, %cst_102 [1] : vector<32x32xf32> to vector<32xf32>
    %295 = vector.shape_cast %294 : vector<32xf32> to vector<32x1xf32>
    %cst_103 = arith.constant 3.200000e+01 : f32
    %296 = vector.broadcast %cst_103 : f32 to vector<32x1xf32>
    %297 = arith.divf %295, %296 : vector<32x1xf32>
    %cst_104 = arith.constant 9.99999996E-13 : f32
    %298 = vector.broadcast %cst_104 : f32 to vector<32x1xf32>
    %299 = arith.addf %297, %298 : vector<32x1xf32>
    %300 = math.rsqrt %299 : vector<32x1xf32>
    %301 = vector.broadcast %300 : vector<32x1xf32> to vector<32x32xf32>
    %302 = arith.mulf %292, %301 : vector<32x32xf32>
    %303 = vector.broadcast %285 : vector<1x32xf32> to vector<32x32xf32>
    %304 = arith.mulf %303, %302 : vector<32x32xf32>
    %305 = vector.broadcast %286 : vector<1x32xf32> to vector<32x32xf32>
    %306 = arith.addf %304, %305 : vector<32x32xf32>
    %c0_105 = arith.constant 0 : index
    %c0_106 = arith.constant 0 : index
    %c0_107 = arith.constant 0 : index
    %307 = vector.load %arg12[%c0_105, %c0_106, %c0_107] : memref<1x32x32xf32, #tpu.memory_space<vmem>>, vector<1x32x32xf32>
    %308 = vector.shape_cast %307 : vector<1x32x32xf32> to vector<32x32xf32>
    %309 = vector.shape_cast %306 : vector<32x32xf32> to vector<1x32x32xf32>
    tpu.vector_store %arg12[%c0_105, %c0_106, %c0_107], %309 {strides = array<i32>} : memref<1x32x32xf32, #tpu.memory_space<vmem>>, vector<1x32x32xf32>,
    return
  }
  func.func @transform_0(%arg0: i32) -> (i32, i32, i32) {
    %c0_i32 = arith.constant 0 : i32
    %c0_i32_0 = arith.constant 0 : i32
    %c0_i32_1 = arith.constant 0 : i32
    return %arg0, %c0_i32, %c0_i32_0 : i32, i32, i32
  }
  func.func @transform_1(%arg0: i32) -> (i32, i32, i32) {
    %c0_i32 = arith.constant 0 : i32
    %c0_i32_0 = arith.constant 0 : i32
    %c0_i32_1 = arith.constant 0 : i32
    return %arg0, %c0_i32, %c0_i32_0 : i32, i32, i32
  }
  func.func @transform_2(%arg0: i32) -> (i32, i32) {
    %c0_i32 = arith.constant 0 : i32
    %c0_i32_0 = arith.constant 0 : i32
    %c0_i32_1 = arith.constant 0 : i32
    return %c0_i32, %c0_i32_0 : i32, i32
  }
  func.func @transform_3(%arg0: i32) -> (i32, i32) {
    %c0_i32 = arith.constant 0 : i32
    %c0_i32_0 = arith.constant 0 : i32
    %c0_i32_1 = arith.constant 0 : i32
    return %c0_i32, %c0_i32_0 : i32, i32
  }
  func.func @transform_4(%arg0: i32) -> (i32, i32) {
    %c0_i32 = arith.constant 0 : i32
    %c0_i32_0 = arith.constant 0 : i32
    %c0_i32_1 = arith.constant 0 : i32
    return %c0_i32, %c0_i32_0 : i32, i32
  }
  func.func @transform_5(%arg0: i32) -> (i32, i32) {
    %c0_i32 = arith.constant 0 : i32
    %c0_i32_0 = arith.constant 0 : i32
    %c0_i32_1 = arith.constant 0 : i32
    return %c0_i32, %c0_i32_0 : i32, i32
  }
  func.func @transform_6(%arg0: i32) -> (i32, i32) {
    %c0_i32 = arith.constant 0 : i32
    %c0_i32_0 = arith.constant 0 : i32
    %c0_i32_1 = arith.constant 0 : i32
    return %c0_i32, %c0_i32_0 : i32, i32
  }
  func.func @transform_7(%arg0: i32) -> (i32, i32) {
    %c0_i32 = arith.constant 0 : i32
    %c0_i32_0 = arith.constant 0 : i32
    %c0_i32_1 = arith.constant 0 : i32
    return %c0_i32, %c0_i32_0 : i32, i32
  }
  func.func @transform_8(%arg0: i32) -> (i32, i32) {
    %c0_i32 = arith.constant 0 : i32
    %c0_i32_0 = arith.constant 0 : i32
    %c0_i32_1 = arith.constant 0 : i32
    return %c0_i32, %c0_i32_0 : i32, i32
  }
  func.func @transform_9(%arg0: i32) -> (i32, i32) {
    %c0_i32 = arith.constant 0 : i32
    %c0_i32_0 = arith.constant 0 : i32
    %c0_i32_1 = arith.constant 0 : i32
    return %c0_i32, %c0_i32_0 : i32, i32
  }
  func.func @transform_10(%arg0: i32) -> (i32, i32) {
    %c0_i32 = arith.constant 0 : i32
    %c0_i32_0 = arith.constant 0 : i32
    %c0_i32_1 = arith.constant 0 : i32
    return %c0_i32, %c0_i32_0 : i32, i32
  }
  func.func @transform_11(%arg0: i32) -> (i32, i32, i32) {
    %c0_i32 = arith.constant 0 : i32
    %c0_i32_0 = arith.constant 0 : i32
    %c0_i32_1 = arith.constant 0 : i32
    return %arg0, %c0_i32, %c0_i32_0 : i32, i32, i32
  }
}

</mosaic_0001>

<bundles_post_ra>
// kernel: fwd.1
= control target key start
LH: loop header
LB: loop body
LE: loop exit
PB: predicated region body
PF: predicated region fallthrough
CT: control target
= control target key end

     0   :  { %v2924_v3 = vmov 0.0|0.0   ;;  %vm2925_vm0 = vmmov 0   ;;  %v2926_v6 = vmov 0.0   ;;  %vm53_vm1 = vcmask 261120   ;;  %s3610_s0 = inlined_call_operand.vmem [shape: f32[1,32,32], index: 0, kind: input, shape index: {}]   ;;  %s3611_s1 = inlined_call_operand.vmem [shape: f32[1,32,1], index: 1, kind: input, shape index: {}]   ;;  %s3612_s2 = inlined_call_operand.vmem [shape: f32[8,32], index: 2, kind: input, shape index: {}]   ;;  %s3613_s3 = inlined_call_operand.vmem [shape: f32[32,8], index: 3, kind: input, shape index: {}]   ;;  %s3614_s4 = inlined_call_operand.vmem [shape: bf16[32,64], index: 4, kind: input, shape index: {}]   ;;  %s3615_s5 = inlined_call_operand.vmem [shape: bf16[32,96], index: 5, kind: input, shape index: {}]   ;;  %s3616_s6 = inlined_call_operand.vmem [shape: bf16[32,64], index: 6, kind: input, shape index: {}]   ;;  %s3617_s7 = inlined_call_operand.vmem [shape: bf16[32,32], index: 7, kind: input, shape index: {}]   ;;  %s3618_s8 = inlined_call_operand.vmem [shape: bf16[32,64], index: 8, kind: input, shape index: {}]   ;;  %s3619_s9 = inlined_call_operand.vmem [shape: bf16[64,32], index: 9, kind: input, shape index: {}]   ;;  %s3620_s10 = inlined_call_operand.vmem [shape: f32[8,64], index: 10, kind: input, shape index: {}]   ;;  %s3621_s11 = inlined_call_operand.hbm [shape: f32[1,32,32], index: 11, kind: output, shape index: {}]  }
   0x1   :  { %v3007_v0 = vld [vmem:[%s3611_s1] sm:$0xff]  ;;  %v3012_v1 = vld [vmem:[%s3611_s1 + $0x8] sm:$0xff]  ;;  %v3017_v2 = vld [vmem:[%s3611_s1 + $0x10] sm:$0xff]  ;;  %2722 = vmatprep.subr.bf16.mxu0 %v2924_v3  ;;  %2541 = vmatprep.mubr.msk.f32.mxu0 %vm2925_vm0, %v2926_v6  ;;  %v2927_v7 = vmov 0  }
   0x2   :  { %v2723_v4 = vpack.c.bf16 %v3012_v1, %v3007_v0  ;;  %v3025_v5 = vld [vmem:[%s3611_s1 + $0x18] sm:$0xff]  ;;  %2769 = vset.pattern.permute.xlu1 %v2927_v7  ;;  %2768 = vset.pattern.permute.xlu0 %v2927_v7  ;;  %v3036_v9 = vld [vmem:[%s3612_s2] sm:$0xff] }
   0x3   :  { %v2726_v8 = vpack.c.bf16 %v3025_v5, %v3017_v2  ;;  %407 = vperm.xlu1 %2769, %v3012_v1  }
   0x4   :  { %2724 = vmatpush3.bf16.msra.mxu0 %v2723_v4 }
   0x5   :  { %2725 = vmatprep.subr.bf16.mxu0 %v2924_v3 }
   0x7   :  { %412 = vperm.xlu1 %2769, %v3017_v2  }
   0x8   :  { %2727 = vmatpush3.bf16.msra.mxu0 %v2726_v8 }
   0x9   :  { %2582 = vmatprep.subr.bf16.mxu0 %v2926_v6 }
   0xb   :  { %2542 = vmatmul.mubr.msk.f32.vlgmr.msra.gmra.mrb[0].mxu0 %vm53_vm1, %v3036_v9 }
   0xc   :  { %2586 = vmatprep.mubr.msk.bf16.mxu0 %vm2925_vm0, %v2926_v6 }
   0xd   :  { %16 = vsyncpa [#allocation3], 0  ;;  %v49_v15 = vld [vmem:[%s3613_s3] sm:$0xff]  ;;  %vm140_vm2 = vcmask 64512   ;;  %v129_v16 = vlaneseq  ;;  %v50_v20 = vld [vmem:[%s3613_s3 + $0x8] sm:$0xff]  ;;  %s2928_s28 = smov 88  }
   0xe   :  { %2546 = vmatprep.mubr.msk.f32.mxu1 %vm140_vm2, %v49_v15  ;;  %v51_v21 = vld [vmem:[%s3613_s3 + $0x10] sm:$0xff]  ;;  %v52_v22 = vld [vmem:[%s3613_s3 + $0x18] sm:$0xff]  ;;  %v2770_v28 = vld [vmem:[%s3614_s4] sm:$0xff]   ;;  %s2930_s29 = smov 80   ;;  %s2931_s30 = smov 120   ;;  %vm657_vm4 = vcmask 1043456  }
   0xf   :  { %v130_v17 = vshrl.u32 %v129_v16, 7  ;;  %v132_v18 = vand.u32 127, %v129_v16  ;;  %v40_v29 = vld [vmem:[%s3610_s0] sm:$0xff]  ;;  %v41_v30 = vld [vmem:[%s3610_s0 + $0x8] sm:$0xff]  ;;  %v42_v34 = vld [vmem:[%s3610_s0 + $0x10] sm:$0xff]  ;;  %s2932_s12 = smov 72  }
  0x10   :  { %v318_v32 = vpack.c.bf16 %v41_v30, %v40_v29  ;;  %v2771_v33 = vld [vmem:[%s3614_s4 + $0x8] sm:$0xff]   ;;  %v43_v35 = vld [vmem:[%s3610_s0 + $0x18] sm:$0xff]  ;;  %v2772_v37 = vld [vmem:[%s3615_s5] sm:$0xff]   ;;  %s2933_s13 = smov 112   ;;  %s2934_s3 = smov 104   ;;  %vm1045_vm5 = vcmask 130048  }
  0x11   :  { %vm133_vm3 = vcmp.eq.s32.totalorder %v130_v17, %v132_v18  ;;  %v319_v36 = vpack.c.bf16 %v43_v35, %v42_v34  ;;  %2583 = vmatpush3.bf16.msra.mxu0 %v2772_v37  ;;  %v2396_v42 = vld [vmem:[%s3620_s10] ss:$0 sm:$0xff]  ;;  %v2773_v59 = vld [vmem:[%s3615_s5 + $0x8] sm:$0xff]   ;;  %s2929_s5 = smov 96   ;;  %s2935_s14 = smov 56   ;;  %vm1047_vm6 = vcmask 195584  }
  0x12   :  { %2584 = vmatprep.subr.bf16.mxu0 %v2926_v6  ;;  %s2936_s15 = smov 64   ;;  %s2937_s16 = smov 40   ;;  %vm2235_vm11 = vcmask 523264  }
  0x13   :  { %s2938_s17 = smov 48   ;;  %s2939_s18 = smov 8  }
  0x14   :  { %s2940_s23 = smov 16   ;;  %s2941_s24 = smov 24  }
  0x15   :  { %2585 = vmatpush3.bf16.msra.mxu0 %v2773_v59 }
  0x16   :  { %2596 = vmatprep.subr.bf16.mxu0 %v2926_v6 }
  0x82   :  { %v408_v40 = vpop.permute.xlu1 %407 }
  0x86   :  { %v413_v50 = vpop.permute.xlu1 %412 }
  0xde   :  { %v123_v10 = vpop.f32.mrb[0].mxu0 }
  0xdf   :  { %v127_v11 = vmul.f32 4.0, %v123_v10  ;;  %v2543_v12 = vpop.f32.mrb[1].mxu0 }
  0xe1   :  { %v128_v13 = vmin.f32 %v127_v11, 1.0 }
  0xe3   :  { %v582_v14 = vmul.f32 0.35355338, %v128_v13  ;;  %136 = vperm.xlu0 %2768, %v128_v13  }
  0xe5   :  { %585 = vperm.xlu1 %2769, %v582_v14  }
  0xe7   :  { %402 = vperm.xlu0 %2768, %v3007_v0  }
  0xeb   :  { %417 = vperm.xlu0 %2768, %v3025_v5  }
 0x162   :  { %v137_v19 = vpop.permute.xlu0 %136 }
 0x163   :  { %2544 = vmatprep.subr.msk.mxu1 %vm133_vm3, %v137_v19 }
 0x164   :  { %2545 = vmatpush3.msk.msra.mxu1 %vm133_vm3, %v137_v19  ;;  %v586_v63 = vpop.permute.xlu1 %585 }
 0x165   :  { %2547 = vmatmul.mubr.msk.f32.vlgmr.msra.gmra.mrb[0].mxu1 %vm140_vm2, %v50_v20  ;;  %2728 = vmatprep.subr.bf16.mxu1 %v2924_v3 }
 0x166   :  { %2549 = vmatprep.mubr.msk.f32.mxu1 %vm140_vm2, %v51_v21  ;;  %v403_v41 = vpop.permute.xlu0 %402 }
 0x169   :  { %2550 = vmatmul.mubr.msk.f32.gmra.mrb[2].mxu1 %vm140_vm2, %v52_v22 }
 0x16a   :  { %2560 = vmatprep.mubr.msk.f32.mxu1 %vm2925_vm0, %v2926_v6  ;;  %v418_v51 = vpop.permute.xlu0 %417 }
 0x238   :  { %v3065_v23 = vpop.f32.mrb[0].mxu1 }
 0x239   :  { %v3067_v24 = vpop.f32.mrb[1].mxu1 }
 0x23a   :  { %v2729_v25 = vpack.c.bf16 %v3065_v23, %v3067_v24 }
 0x23c   :  { %v3071_v26 = vpop.f32.mrb[2].mxu1  ;;  %2730 = vmatpush3.bf16.msra.mxu1 %v2729_v25 }
 0x23d   :  { %v3073_v27 = vpop.f32.mrb[3].mxu1  ;;  %2731 = vmatprep.subr.bf16.mxu1 %v2924_v3 }
 0x23e   :  { %v2732_v31 = vpack.c.bf16 %v3071_v26, %v3073_v27 }
 0x240   :  { %2733 = vmatpush3.bf16.msra.mxu1 %v2732_v31 }
 0x241   :  { %2563 = vmatprep.subr.bf16.mxu1 %v2770_v28 }
 0x243   :  { %2561 = vmatmul.mubr.msk.f32.vlgmr.msra.gmra.mrb[4].mxu1 %vm53_vm1, %v3036_v9 }
 0x244   :  { %2564 = vmatpush3.bf16.msra.mxu1 %v2770_v28  ;;  %2567 = vmatprep.mubr.msk.bf16.mxu1 %vm53_vm1, %v318_v32 }
 0x245   :  { %2565 = vmatprep.subr.bf16.mxu1 %v2771_v33 }
 0x248   :  { %2566 = vmatpush3.bf16.msra.mxu1 %v2771_v33 }
 0x249   :  { %2734 = vmatprep.subr.bf16.mxu1 %v2924_v3 }
 0x24b   :  { %2568 = vmatmul.mubr.msk.bf16.vlgmr.msra.gmra.mrb[8].mxu1 %vm53_vm1, %v319_v36 }
 0x24c   :  { %2579 = vmatprep.mubr.msk.f32.mxu1 %vm2925_vm0, %v2926_v6 }
 0x316   :  { %v3107_v38 = vpop.f32.mrb[4].mxu1 }
 0x317   :  { %v2562_v39 = vpop.f32.mrb[5].mxu1  ;;  %v316_v25 = vsub.f32 1.0, %v3107_v38 }
 0x319   :  { %v317_v28 = vmul.f32 -10000.0, %v316_v25 }
 0x31e   :  { %v3112_v43 = vpop.f32.mrb[8].mxu1 }
 0x31f   :  { %v398_v44 = vadd.f32 %v3112_v43, %v2396_v42  ;;  %v3115_v45 = vpop.f32.mrb[9].mxu1 }
 0x320   :  { %v396_v46 = vadd.f32 %v2396_v42, %v3115_v45  ;;  %v3118_v47 = vpop.f32.mrb[10].mxu1 }
 0x321   :  { %v399_v48 = vadd.f32 %v3118_v47, %v2396_v42  ;;  %v3121_v49 = vpop.f32.mrb[11].mxu1  ;;  %v422_v53 = vmul.f32 %v413_v50, %v398_v44 }
 0x322   :  { %v397_v52 = vadd.f32 %v2396_v42, %v3121_v49  ;;  %v420_v55 = vmul.f32 %v403_v41, %v396_v46 }
 0x323   :  { %v423_v54 = vmul.f32 %v418_v51, %v399_v48 }
 0x324   :  { %v421_v56 = vmul.f32 %v408_v40, %v397_v52 }
 0x325   :  { %v2738_v57 = vpack.c.bf16 %v423_v54, %v422_v53 }
 0x326   :  { %v2735_v58 = vpack.c.bf16 %v421_v56, %v420_v55 }
 0x328   :  { %2736 = vmatpush3.bf16.msra.mxu1 %v2735_v58 }
 0x329   :  { %2737 = vmatprep.subr.bf16.mxu1 %v2924_v3 }
 0x32c   :  { %2739 = vmatpush3.bf16.msra.mxu1 %v2738_v57 }
 0x32d   :  { %2590 = vmatprep.subr.bf16.mxu1 %v2926_v6 }
 0x32f   :  { %2580 = vmatmul.mubr.msk.f32.vlgmr.msra.gmra.mrb[6].mxu1 %vm53_vm1, %v3036_v9 }
 0x330   :  { %2592 = vmatprep.mubr.msk.bf16.mxu1 %vm2925_vm0, %v2926_v6 }
 0x402   :  { %v518_v60 = vpop.f32.mrb[6].mxu1 }
 0x403   :  { %v522_v61 = vpack.c.bf16 %v518_v60, %v518_v60  ;;  %v2581_v62 = vpop.f32.mrb[7].mxu1 }
 0x405   :  { %2587 = vmatmul.mubr.msk.bf16.vlgmr.msra.gmra.mrb[4].mxu0 %vm53_vm1, %v522_v61 }
 0x406   :  { %2598 = vmatprep.mubr.msk.bf16.mxu0 %vm2925_vm0, %v2926_v6 }
 0x4d8   :  { %v576_v3 = vpop.f32.mrb[4].mxu0 }
 0x4d9   :  { %v588_v4 = vmul.f32 %v586_v63, %v576_v3  ;;  %v3137_v7 = vpack.c.bf16 %v576_v3, %v576_v3  ;;  %v2588_v8 = vpop.f32.mrb[5].mxu0 }
 0x4da   :  { %v579_v9 = vpop.f32.mrb[6].mxu0 }
 0x4db   :  { %704 = vrot.lane.b32.xlu1 %v3137_v7, %s2928_s28  ;;  %592 = vrot.lane.b32.xlu0 %v3137_v7, %s2929_s5  ;;  %v2589_v10 = vpop.f32.mrb[7].mxu0  ;;  %v589_v11 = vpack.c.bf16 %v588_v4, %v588_v4 }
 0x4df   :  { %814 = vrot.lane.b32.xlu1 %v3137_v7, %s2930_s29  ;;  %702 = vrot.lane.b32.xlu0 %v589_v11, %s2931_s30 }
 0x4e3   :  { %924 = vrot.lane.b32.xlu1 %v3137_v7, %s2932_s12  ;;  %812 = vrot.lane.b32.xlu0 %v589_v11, %s2933_s13 }
 0x4e7   :  { %922 = vrot.lane.b32.xlu0 %v589_v11, %s2934_s3 }
 0x54d   :  { %v593_v12 = vpop.permute.xlu0 %592  ;;  %v705_v14 = vpop.permute.xlu1 %704 }
 0x54e   :  { %v598_v13 = vsel %vm140_vm2, %v593_v12, 0  ;;  %v710_v15 = vsel %vm140_vm2, %v705_v14, 0 }
 0x54f   :  { %2591 = vmatpush3.bf16.xpose.msra.mxu1 %v598_v13 }
 0x550   :  { %2602 = vmatprep.subr.bf16.mxu1 %v2926_v6 }
 0x551   :  { %v815_v16 = vpop.permute.xlu1 %814  ;;  %v703_v17 = vpop.permute.xlu0 %702 }
 0x552   :  { %v820_v18 = vsel %vm140_vm2, %v815_v16, 0 }
 0x555   :  { %v925_v19 = vpop.permute.xlu1 %924  ;;  %v813_v20 = vpop.permute.xlu0 %812 }
 0x556   :  { %2593 = vmatmul.mubr.msk.bf16.vlgmr.msra.gmra.mrb[12].mxu1 %vm140_vm2, %v589_v11  ;;  %v930_v21 = vsel %vm140_vm2, %v925_v19, 0 }
 0x557   :  { %2603 = vmatpush3.bf16.xpose.msra.mxu1 %v710_v15  ;;  %2604 = vmatprep.mubr.msk.bf16.mxu1 %vm2925_vm0, %v2926_v6 }
 0x558   :  { %2614 = vmatprep.subr.bf16.mxu1 %v2926_v6 }
 0x559   :  { %v923_v22 = vpop.permute.xlu0 %922 }
 0x55e   :  { %2605 = vmatmul.mubr.msk.bf16.vlgmr.msra.gmra.mrb[16].mxu1 %vm140_vm2, %v703_v17 }
 0x55f   :  { %2615 = vmatpush3.bf16.xpose.msra.mxu1 %v820_v18  ;;  %2616 = vmatprep.mubr.msk.bf16.mxu1 %vm2925_vm0, %v2926_v6 }
 0x560   :  { %2626 = vmatprep.subr.bf16.mxu1 %v2926_v6 }
 0x566   :  { %2617 = vmatmul.mubr.msk.bf16.vlgmr.msra.gmra.mrb[20].mxu1 %vm140_vm2, %v813_v20 }
 0x567   :  { %2627 = vmatpush3.bf16.xpose.msra.mxu1 %v930_v21  ;;  %2628 = vmatprep.mubr.msk.bf16.mxu1 %vm2925_vm0, %v2926_v6 }
 0x568   :  { %2638 = vmatprep.subr.bf16.mxu1 %v2926_v6 }
 0x56e   :  { %2629 = vmatmul.mubr.msk.bf16.vlgmr.msra.gmra.mrb[24].mxu1 %vm140_vm2, %v923_v22 }
 0x56f   :  { %2642 = vmatprep.mubr.msk.bf16.mxu1 %vm2925_vm0, %v2926_v6 }
 0x629   :  { %v634_v29 = vpop.f32.mrb[12].mxu1 }
 0x62a   :  { %v635_v30 = vadd.f32 %v634_v29, %v317_v28  ;;  %v2594_v31 = vpop.f32.mrb[13].mxu1 }
 0x62b   :  { %v637_v32 = vpop.f32.mrb[14].mxu1 }
 0x62c   :  { %v2595_v33 = vpop.f32.mrb[15].mxu1  ;;  %v640_v34 = vsel %vm140_vm2, %v635_v30, -inf }
 0x62d   :  { %641 = vmax.xlane.f32.xlu1 %v640_v34 }
 0x631   :  { %v746_v35 = vpop.f32.mrb[16].mxu1 }
 0x632   :  { %v747_v36 = vadd.f32 %v746_v35, %v317_v28  ;;  %v2606_v37 = vpop.f32.mrb[17].mxu1 }
 0x633   :  { %v749_v39 = vpop.f32.mrb[18].mxu1 }
 0x634   :  { %v2607_v40 = vpop.f32.mrb[19].mxu1  ;;  %v752_v41 = vsel %vm140_vm2, %v747_v36, -inf }
 0x635   :  { %753 = vmax.xlane.f32.xlu0 %v752_v41 }
 0x639   :  { %v856_v42 = vpop.f32.mrb[20].mxu1 }
 0x63a   :  { %v857_v44 = vadd.f32 %v856_v42, %v317_v28  ;;  %v2618_v38 = vpop.f32.mrb[21].mxu1 }
 0x63b   :  { %v859_v46 = vpop.f32.mrb[22].mxu1 }
 0x63c   :  { %v2619_v48 = vpop.f32.mrb[23].mxu1  ;;  %v862_v50 = vsel %vm140_vm2, %v857_v44, -inf }
 0x63d   :  { %863 = vmax.xlane.f32.xlu0 %v862_v50 }
 0x641   :  { %v966_v51 = vpop.f32.mrb[24].mxu1 }
 0x642   :  { %v967_v52 = vadd.f32 %v966_v51, %v317_v28  ;;  %v2630_v53 = vpop.f32.mrb[25].mxu1 }
 0x643   :  { %v969_v54 = vpop.f32.mrb[26].mxu1 }
 0x644   :  { %v2631_v55 = vpop.f32.mrb[27].mxu1  ;;  %v972_v56 = vsel %vm140_vm2, %v967_v52, -inf }
 0x645   :  { %973 = vmax.xlane.f32.xlu1 %v972_v56 }
 0x6ba   :  { %v642_v57 = vpop.xlane.xlu1 %641 }
 0x6bb   :  { %v643_v58 = vsub.f32 %v635_v30, %v642_v57 }
 0x6bd   :  { %v644_v59 = vmul.f32 1.442695, %v643_v58  ;;  %v2774_v58 = vld [vmem:[%s3616_s6] sm:$0xff]  }
 0x6be   :  { %2639 = vmatpush3.bf16.msra.mxu1 %v2774_v58 }
 0x6bf   :  { %2784 = vpow2.f32 %v644_v59  ;;  %2640 = vmatprep.subr.bf16.mxu1 %v2926_v6  ;;  %v2775_v59 = vld [vmem:[%s3616_s6 + $0x8] sm:$0xff]  }
 0x6c2   :  { %v754_v60 = vpop.xlane.xlu0 %753  ;;  %2641 = vmatpush3.bf16.msra.mxu1 %v2775_v59 }
 0x6c3   :  { %v755_v61 = vsub.f32 %v747_v36, %v754_v60 }
 0x6c5   :  { %v756_v62 = vmul.f32 1.442695, %v755_v61 }
 0x6c7   :  { %2786 = vpow2.f32 %v756_v62  ;;  %v424_v62 = vmul.f32 0.35355338, %v3007_v0 }
 0x6c9   :  { %v2785_v63 = vpop.eup %2784 }
 0x6ca   :  { %v864_v3 = vpop.xlane.xlu0 %863  ;;  %v646_v4 = vsel %vm140_vm2, %v2785_v63, 0.0 }
 0x6cb   :  { %v865_v8 = vsub.f32 %v857_v44, %v864_v3  ;;  %647 = vadd.xlane.f32.xlu0 %v646_v4  ;;  %v426_v4 = vmul.f32 0.35355338, %v3017_v2 }
 0x6cd   :  { %v866_v9 = vmul.f32 1.442695, %v865_v8 }
 0x6cf   :  { %2788 = vpow2.f32 %v866_v9  ;;  %v425_v9 = vmul.f32 0.35355338, %v3012_v1 }
 0x6d1   :  { %v2787_v10 = vpop.eup %2786 }
 0x6d2   :  { %v758_v11 = vsel %vm140_vm2, %v2787_v10, 0.0  ;;  %v974_v14 = vpop.xlane.xlu1 %973 }
 0x6d3   :  { %759 = vadd.xlane.f32.xlu1 %v758_v11  ;;  %v975_v15 = vsub.f32 %v967_v52, %v974_v14 }
 0x6d5   :  { %v976_v16 = vmul.f32 1.442695, %v975_v15 }
 0x6d7   :  { %2790 = vpow2.f32 %v976_v16 }
 0x6d9   :  { %v2789_v12 = vpop.eup %2788 }
 0x6da   :  { %v868_v13 = vsel %vm140_vm2, %v2789_v12, 0.0 }
 0x6db   :  { %869 = vadd.xlane.f32.xlu0 %v868_v13 }
 0x6e1   :  { %v2791_v17 = vpop.eup %2790 }
 0x6e2   :  { %v978_v18 = vsel %vm140_vm2, %v2791_v17, 0.0 }
 0x6e4   :  { %764 = vrot.lane.b32.xlu1 %v3137_v7, %s2935_s14 }
 0x6f1   :  { %652 = vrot.lane.b32.xlu0 %v3137_v7, %s2936_s15 }
 0x6f5   :  { %984 = vrot.lane.b32.xlu0 %v3137_v7, %s2937_s16 }
 0x708   :  { %979 = vadd.xlane.f32.xlu1 %v978_v18 }
 0x719   :  { %874 = vrot.lane.b32.xlu1 %v3137_v7, %s2938_s17 }
 0x758   :  { %v648_v19 = vpop.xlane.xlu0 %647 }
 0x759   :  { %2792 = vrcp.f32 %v648_v19 }
 0x760   :  { %v760_v20 = vpop.xlane.xlu1 %759 }
 0x761   :  { %2794 = vrcp.f32 %v760_v20 }
 0x763   :  { %v2793_v21 = vpop.eup %2792 }
 0x764   :  { %v650_v25 = vmul.f32 %v2793_v21, %v2785_v63  ;;  %v765_v30 = vpop.permute.xlu1 %764 }
 0x765   :  { %v770_v33 = vsel %vm657_vm4, %v765_v30, 0 }
 0x766   :  { %v651_v31 = vpack.c.bf16 %v650_v25, %v650_v25 }
 0x768   :  { %v870_v22 = vpop.xlane.xlu0 %869 }
 0x769   :  { %2796 = vrcp.f32 %v870_v22 }
 0x76b   :  { %v2795_v32 = vpop.eup %2794 }
 0x76c   :  { %v653_v28 = vpop.permute.xlu0 %652  ;;  %v762_v7 = vmul.f32 %v2795_v32, %v2787_v10 }
 0x76d   :  { %v659_v29 = vsel %vm657_vm4, %v653_v28, 0 }
 0x76e   :  { %2597 = vmatpush3.bf16.msra.mxu0 %v659_v29  ;;  %v763_v34 = vpack.c.bf16 %v762_v7, %v762_v7 }
 0x76f   :  { %2608 = vmatprep.subr.bf16.mxu0 %v2926_v6 }
 0x770   :  { %v985_v41 = vpop.permute.xlu0 %984 }
 0x771   :  { %2599 = vmatmul.mubr.msk.bf16.vlgmr.msra.gmra.mrb[8].mxu0 %vm140_vm2, %v651_v31  ;;  %v990_v44 = vsel %vm657_vm4, %v985_v41, 0 }
 0x772   :  { %2609 = vmatpush3.bf16.msra.mxu0 %v770_v33  ;;  %2610 = vmatprep.mubr.msk.bf16.mxu0 %vm2925_vm0, %v2926_v6 }
 0x773   :  { %2620 = vmatprep.subr.bf16.mxu0 %v2926_v6  ;;  %v2797_v35 = vpop.eup %2796 }
 0x774   :  { %v872_v37 = vmul.f32 %v2797_v35, %v2789_v12  ;;  %v427_v12 = vmul.f32 0.35355338, %v3025_v5 }
 0x776   :  { %v873_v42 = vpack.c.bf16 %v872_v37, %v872_v37 }
 0x779   :  { %2611 = vmatmul.mubr.msk.bf16.vlgmr.msra.gmra.mrb[12].mxu0 %vm140_vm2, %v763_v34 }
 0x77a   :  { %2622 = vmatprep.mubr.msk.bf16.mxu0 %vm2925_vm0, %v2926_v6 }
 0x795   :  { %v980_v36 = vpop.xlane.xlu1 %979 }
 0x796   :  { %2798 = vrcp.f32 %v980_v36 }
 0x799   :  { %v875_v39 = vpop.permute.xlu1 %874 }
 0x79a   :  { %v880_v40 = vsel %vm657_vm4, %v875_v39, 0 }
 0x79b   :  { %2621 = vmatpush3.bf16.msra.mxu0 %v880_v40 }
 0x79c   :  { %2632 = vmatprep.subr.bf16.mxu0 %v2926_v6 }
 0x79e   :  { %2623 = vmatmul.mubr.msk.bf16.vlgmr.msra.gmra.mrb[16].mxu0 %vm140_vm2, %v873_v42 }
 0x79f   :  { %2633 = vmatpush3.bf16.msra.mxu0 %v990_v44  ;;  %2634 = vmatprep.mubr.msk.bf16.mxu0 %vm2925_vm0, %v2926_v6 }
 0x7a0   :  { %v2799_v38 = vpop.eup %2798 }
 0x7a1   :  { %v982_v46 = vmul.f32 %v2799_v38, %v2791_v17 }
 0x7a3   :  { %v983_v48 = vpack.c.bf16 %v982_v46, %v982_v46 }
 0x7a6   :  { %2635 = vmatmul.mubr.msk.bf16.vlgmr.msra.gmra.mrb[20].mxu0 %vm140_vm2, %v983_v48  ;;  %v308_v48 = vsub.f32 1.0, %v3067_v24 }
 0x844   :  { %v695_v50 = vpop.f32.mrb[8].mxu0 }
 0x845   :  { %v2600_v51 = vpop.f32.mrb[9].mxu0 }
 0x846   :  { %v698_v52 = vpop.f32.mrb[10].mxu0  ;;  %v311_v51 = vsub.f32 1.0, %v3071_v26 }
 0x847   :  { %v2601_v53 = vpop.f32.mrb[11].mxu0  ;;  %v312_v52 = vmul.f32 -10000.0, %v308_v48 }
 0x848   :  { %v310_v53 = vsub.f32 1.0, %v3073_v27 }
 0x84c   :  { %v806_v54 = vpop.f32.mrb[12].mxu0 }
 0x84d   :  { %1033 = vrot.lane.b32.xlu1 %v806_v54, %s2939_s18  ;;  %v2612_v55 = vpop.f32.mrb[13].mxu0 }
 0x84e   :  { %v809_v56 = vpop.f32.mrb[14].mxu0 }
 0x84f   :  { %v2613_v57 = vpop.f32.mrb[15].mxu0 }
 0x850   :  { %v315_v57 = vmul.f32 -10000.0, %v311_v51 }
 0x871   :  { %v916_v60 = vpop.f32.mrb[16].mxu0 }
 0x872   :  { %1037 = vrot.lane.b32.xlu0 %v916_v60, %s2940_s23  ;;  %v2624_v61 = vpop.f32.mrb[17].mxu0 }
 0x873   :  { %v919_v63 = vpop.f32.mrb[18].mxu0  ;;  %v314_v61 = vmul.f32 -10000.0, %v310_v53 }
 0x874   :  { %v2625_v3 = vpop.f32.mrb[19].mxu0 }
 0x876   :  { %430 = vperm.xlu0 %2768, %v424_v62  }
 0x879   :  { %v1026_v8 = vpop.f32.mrb[20].mxu0 }
 0x87a   :  { %440 = vperm.xlu0 %2768, %v426_v4   ;;  %1041 = vrot.lane.b32.xlu1 %v1026_v8, %s2941_s24  ;;  %v2636_v6 = vpop.f32.mrb[21].mxu0 }
 0x87b   :  { %v1029_v10 = vpop.f32.mrb[22].mxu0 }
 0x87c   :  { %v2637_v11 = vpop.f32.mrb[23].mxu0 }
 0x87e   :  { %435 = vperm.xlu1 %2769, %v425_v9  }
 0x882   :  { %445 = vperm.xlu1 %2769, %v427_v12  }
 0x8bf   :  { %v1034_v0 = vpop.permute.xlu1 %1033 }
 0x8c0   :  { %v1044_v2 = vsel %vm140_vm2, %v695_v50, %v1034_v0  ;;  %v309_v50 = vsub.f32 1.0, %v3065_v23 }
 0x8c2   :  { %v313_v56 = vmul.f32 -10000.0, %v309_v50 }
 0x8e4   :  { %v1038_v13 = vpop.permute.xlu0 %1037 }
 0x8e5   :  { %v1046_v14 = vsel %vm1045_vm5, %v1044_v2, %v1038_v13 }
 0x8ec   :  { %v1042_v15 = vpop.permute.xlu1 %1041 }
 0x8ed   :  { %v1048_v16 = vsel %vm1047_vm6, %v1046_v14, %v1042_v15 }
 0x8ee   :  { %v1049_v17 = vpack.c.bf16 %v1048_v16, %v1048_v16 }
 0x8f0   :  { %2643 = vmatmul.mubr.msk.bf16.vlgmr.msra.gmra.mrb[28].mxu1 %vm53_vm1, %v1049_v17 }
 0x8f5   :  { %v431_v1 = vpop.permute.xlu0 %430 }
 0x8f6   :  { %v448_v19 = vmul.f32 %v431_v1, %v3115_v45 }
 0x8f9   :  { %v441_v20 = vpop.permute.xlu0 %440 }
 0x8fa   :  { %v450_v25 = vmul.f32 %v3112_v43, %v441_v20 }
 0x8fd   :  { %v436_v18 = vpop.permute.xlu1 %435 }
 0x8fe   :  { %v449_v5 = vmul.f32 %v436_v18, %v3121_v49 }
 0x900   :  { %v1109_v21 = vpack.c.bf16 %v449_v5, %v448_v19 }
 0x901   :  { %v446_v22 = vpop.permute.xlu1 %445 }
 0x902   :  { %v451_v28 = vmul.f32 %v3118_v47, %v446_v22  ;;  %1114 = vrot.lane.b32.xlu0 %v1109_v21, %s2929_s5 }
 0x904   :  { %v1110_v29 = vpack.c.bf16 %v451_v28, %v450_v25 }
 0x906   :  { %1116 = vrot.lane.b32.xlu1 %v1110_v29, %s2929_s5 }
 0x90a   :  { %1283 = vrot.lane.b32.xlu1 %v1109_v21, %s2928_s28 }
 0x974   :  { %v1115_v30 = vpop.permute.xlu0 %1114 }
 0x975   :  { %2648 = vmatprep.mubr.msk.bf16.mxu0 %vm140_vm2, %v1115_v30 }
 0x978   :  { %v1117_v33 = vpop.permute.xlu1 %1116 }
 0x97c   :  { %v1284_v7 = vpop.permute.xlu1 %1283 }
 0x9c3   :  { %v1103_v45 = vpop.f32.mrb[28].mxu1 }
 0x9c4   :  { %v3226_v31 = vpack.c.bf16 %v1103_v45, %v1103_v45  ;;  %v2644_v49 = vpop.f32.mrb[29].mxu1 }
 0x9c5   :  { %v1106_v32 = vpop.f32.mrb[30].mxu1 }
 0x9c6   :  { %1457 = vrot.lane.b32.xlu1 %v3226_v31, %s2933_s13  ;;  %1287 = vrot.lane.b32.xlu0 %v3226_v31, %s2931_s30  ;;  %v2645_v43 = vpop.f32.mrb[31].mxu1  ;;  %v1125_v47 = vsel %vm140_vm2, %v3226_v31, 0 }
 0x9c7   :  { %2740 = vmatprep.subr.msk.bf16.mxu0 %vm140_vm2, %v3226_v31 }
 0x9c8   :  { %2647 = vmatpush3.bf16.xpose.msra.mxu0 %v1125_v47 }
 0x9ca   :  { %1455 = vrot.lane.b32.xlu1 %v1110_v29, %s2930_s29  ;;  %1285 = vrot.lane.b32.xlu0 %v1110_v29, %s2928_s28 }
 0x9ce   :  { %1623 = vrot.lane.b32.xlu1 %v1109_v21, %s2932_s12  ;;  %1453 = vrot.lane.b32.xlu0 %v1109_v21, %s2930_s29 }
 0x9cf   :  { %2649 = vmatmul.mubr.msk.bf16.vlgmr.msra.gmra.mrb[24].mxu0 %vm140_vm2, %v1117_v33 }
 0x9d0   :  { %2660 = vmatprep.mubr.msk.bf16.mxu0 %vm140_vm2, %v1284_v7 }
 0x9d2   :  { %1627 = vrot.lane.b32.xlu0 %v3226_v31, %s2934_s3 }
 0x9d6   :  { %1625 = vrot.lane.b32.xlu0 %v1110_v29, %s2932_s12 }
 0xa38   :  { %v1288_v34 = vpop.permute.xlu0 %1287  ;;  %v1458_v36 = vpop.permute.xlu1 %1457 }
 0xa39   :  { %v1296_v35 = vsel %vm140_vm2, %v1288_v34, 0  ;;  %2742 = vmatprep.subr.msk.bf16.mxu0 %vm140_vm2, %v1288_v34  ;;  %v1466_v40 = vsel %vm140_vm2, %v1458_v36, 0 }
 0xa3a   :  { %2659 = vmatpush3.bf16.xpose.msra.mxu0 %v1296_v35 }
 0xa3b   :  { %2744 = vmatprep.subr.msk.bf16.mxu0 %vm140_vm2, %v1458_v36 }
 0xa3c   :  { %v1286_v37 = vpop.permute.xlu0 %1285  ;;  %v1456_v41 = vpop.permute.xlu1 %1455 }
 0xa40   :  { %v1454_v39 = vpop.permute.xlu0 %1453  ;;  %v1624_v44 = vpop.permute.xlu1 %1623 }
 0xa41   :  { %2661 = vmatmul.mubr.msk.bf16.vlgmr.msra.gmra.mrb[28].mxu0 %vm140_vm2, %v1286_v37 }
 0xa42   :  { %2671 = vmatpush3.bf16.xpose.msra.mxu0 %v1466_v40  ;;  %2672 = vmatprep.mubr.msk.bf16.mxu0 %vm140_vm2, %v1454_v39 }
 0xa44   :  { %v1628_v42 = vpop.permute.xlu0 %1627 }
 0xa45   :  { %2746 = vmatprep.subr.msk.bf16.mxu0 %vm140_vm2, %v1628_v42  ;;  %v1636_v38 = vsel %vm140_vm2, %v1628_v42, 0 }
 0xa48   :  { %v1626_v46 = vpop.permute.xlu0 %1625 }
 0xa49   :  { %2673 = vmatmul.mubr.msk.bf16.vlgmr.msra.gmra.mrb[32].mxu0 %vm140_vm2, %v1456_v41 }
 0xa4a   :  { %2683 = vmatpush3.bf16.xpose.msra.mxu0 %v1636_v38  ;;  %2684 = vmatprep.mubr.msk.bf16.mxu0 %vm140_vm2, %v1624_v44 }
 0xa51   :  { %2685 = vmatmul.mubr.msk.bf16.vlgmr.msra.gmra.mrb[36].mxu0 %vm140_vm2, %v1626_v46 }
 0xaa2   :  { %v2650_v54 = vpop.f32.mrb[24].mxu0 }
 0xaa3   :  { %v1161_v55 = vpop.f32.mrb[25].mxu0  ;;  %v3268_v24 = vadd.f32 %v2650_v54, %v314_v61 }
 0xaa4   :  { %v3260_v58 = vadd.f32 %v1161_v55, %v312_v52  ;;  %v2651_v59 = vpop.f32.mrb[26].mxu0 }
 0xaa5   :  { %v1164_v60 = vpop.f32.mrb[27].mxu0  ;;  %v3262_v62 = vadd.f32 %v2651_v59, %v315_v57  ;;  %v1182_v3 = vsel %vm140_vm2, %v3268_v24, -inf }
 0xaa6   :  { %v3264_v63 = vadd.f32 %v1164_v60, %v313_v56  ;;  %v1176_v23 = vsel %vm140_vm2, %v3260_v58, -inf }
 0xaa7   :  { %1177 = vmax.xlane.f32.xlu1 %v1176_v23  ;;  %v1185_v27 = vsel %vm140_vm2, %v3262_v62, -inf }
 0xaa8   :  { %v1179_v26 = vsel %vm140_vm2, %v3264_v63, -inf }
 0xaa9   :  { %1180 = vmax.xlane.f32.xlu0 %v1179_v26 }
 0xaab   :  { %1186 = vmax.xlane.f32.xlu1 %v1185_v27 }
 0xaad   :  { %1183 = vmax.xlane.f32.xlu0 %v1182_v3 }
 0xb14   :  { %v2662_v4 = vpop.f32.mrb[28].mxu0 }
 0xb15   :  { %v1332_v8 = vpop.f32.mrb[29].mxu0  ;;  %v3280_v12 = vadd.f32 %v2662_v4, %v314_v61 }
 0xb16   :  { %v3276_v6 = vadd.f32 %v1332_v8, %v312_v52  ;;  %v2663_v9 = vpop.f32.mrb[30].mxu0 }
 0xb17   :  { %v3278_v10 = vadd.f32 %v2663_v9, %v315_v57  ;;  %v1335_v11 = vpop.f32.mrb[31].mxu0  ;;  %v1353_v15 = vsel %vm140_vm2, %v3280_v12, -inf }
 0xb18   :  { %v1347_v0 = vsel %vm140_vm2, %v3276_v6, -inf  ;;  %v3284_v13 = vadd.f32 %v1335_v11, %v313_v56 }
 0xb19   :  { %1348 = vmax.xlane.f32.xlu0 %v1347_v0  ;;  %v1356_v2 = vsel %vm140_vm2, %v3278_v10, -inf }
 0xb1a   :  { %1357 = vmax.xlane.f32.xlu1 %v1356_v2  ;;  %v1350_v17 = vsel %vm140_vm2, %v3284_v13, -inf }
 0xb1c   :  { %v2674_v14 = vpop.f32.mrb[32].mxu0 }
 0xb1d   :  { %v1502_v16 = vpop.f32.mrb[33].mxu0  ;;  %1354 = vmax.xlane.f32.xlu0 %v1353_v15  ;;  %v3296_v20 = vadd.f32 %v2674_v14, %v314_v61 }
 0xb1e   :  { %v3292_v1 = vadd.f32 %v1502_v16, %v312_v52  ;;  %v2675_v18 = vpop.f32.mrb[34].mxu0  ;;  %1351 = vmax.xlane.f32.xlu1 %v1350_v17 }
 0xb1f   :  { %v3294_v19 = vadd.f32 %v2675_v18, %v315_v57  ;;  %v1505_v5 = vpop.f32.mrb[35].mxu0  ;;  %v1523_v29 = vsel %vm140_vm2, %v3296_v20, -inf }
 0xb20   :  { %v1517_v21 = vsel %vm140_vm2, %v3292_v1, -inf  ;;  %v3300_v22 = vadd.f32 %v1505_v5, %v313_v56 }
 0xb21   :  { %1518 = vmax.xlane.f32.xlu0 %v1517_v21  ;;  %v1526_v25 = vsel %vm140_vm2, %v3294_v19, -inf }
 0xb22   :  { %1527 = vmax.xlane.f32.xlu1 %v1526_v25  ;;  %v1520_v45 = vsel %vm140_vm2, %v3300_v22, -inf }
 0xb24   :  { %v2686_v28 = vpop.f32.mrb[36].mxu0 }
 0xb25   :  { %v1672_v30 = vpop.f32.mrb[37].mxu0  ;;  %1524 = vmax.xlane.f32.xlu0 %v1523_v29  ;;  %v3312_v33 = vadd.f32 %v2686_v28, %v314_v61 }
 0xb26   :  { %v3308_v49 = vadd.f32 %v1672_v30, %v312_v52  ;;  %v2687_v32 = vpop.f32.mrb[38].mxu0  ;;  %1521 = vmax.xlane.f32.xlu1 %v1520_v45 }
 0xb27   :  { %v3310_v43 = vadd.f32 %v2687_v32, %v315_v57  ;;  %v1675_v47 = vpop.f32.mrb[39].mxu0  ;;  %v1693_v36 = vsel %vm140_vm2, %v3312_v33, -inf }
 0xb28   :  { %v1687_v7 = vsel %vm140_vm2, %v3308_v49, -inf  ;;  %v3316_v34 = vadd.f32 %v1675_v47, %v313_v56 }
 0xb29   :  { %1688 = vmax.xlane.f32.xlu0 %v1687_v7  ;;  %v1696_v35 = vsel %vm140_vm2, %v3310_v43, -inf }
 0xb2a   :  { %1697 = vmax.xlane.f32.xlu1 %v1696_v35  ;;  %v1690_v37 = vsel %vm140_vm2, %v3316_v34, -inf }
 0xb2d   :  { %1694 = vmax.xlane.f32.xlu0 %v1693_v36 }
 0xb2e   :  { %1691 = vmax.xlane.f32.xlu1 %v1690_v37 }
 0xb34   :  { %v1178_v40 = vpop.xlane.xlu1 %1177 }
 0xb35   :  { %v1188_v46 = vsub.f32 %v3260_v58, %v1178_v40 }
 0xb36   :  { %v1181_v39 = vpop.xlane.xlu0 %1180 }
 0xb37   :  { %v1189_v50 = vsub.f32 %v3264_v63, %v1181_v39  ;;  %v1192_v52 = vmul.f32 1.442695, %v1188_v46 }
 0xb38   :  { %v1187_v42 = vpop.xlane.xlu1 %1186 }
 0xb39   :  { %v1191_v38 = vsub.f32 %v3262_v62, %v1187_v42  ;;  %v1194_v53 = vmul.f32 1.442695, %v1189_v50 }
 0xb3a   :  { %v1184_v41 = vpop.xlane.xlu0 %1183 }
 0xb3b   :  { %v1190_v44 = vsub.f32 %v3268_v24, %v1184_v41  ;;  %v1198_v51 = vmul.f32 1.442695, %v1191_v38 }
 0xb3d   :  { %v1196_v48 = vmul.f32 1.442695, %v1190_v44 }
 0xb3f   :  { %1393 = vrot.lane.b32.xlu1 %v3226_v31, %s2928_s28  ;;  %2800 = vpow2.f32 %v1196_v48 }
 0xb40   :  { %2802 = vpow2.f32 %v1198_v51 }
 0xb41   :  { %2804 = vpow2.f32 %v1192_v52 }
 0xb42   :  { %2806 = vpow2.f32 %v1194_v53 }
 0xb43   :  { %1223 = vrot.lane.b32.xlu0 %v3226_v31, %s2929_s5 }
 0xb49   :  { %v3332_v54 = vpop.eup %2800 }
 0xb4a   :  { %v3334_v55 = vpop.eup %2802  ;;  %v1206_v56 = vsel %vm140_vm2, %v3332_v54, 0.0 }
 0xb4b   :  { %v3338_v57 = vpop.eup %2804  ;;  %v1209_v58 = vsel %vm140_vm2, %v3334_v55, 0.0 }
 0xb4c   :  { %v3342_v59 = vpop.eup %2806  ;;  %v1200_v60 = vsel %vm140_vm2, %v3338_v57, 0.0 }
 0xb4d   :  { %v1203_v61 = vsel %vm140_vm2, %v3342_v59, 0.0 }
 0xb62   :  { %1207 = vadd.xlane.f32.xlu0 %v1206_v56 }
 0xb63   :  { %1210 = vadd.xlane.f32.xlu1 %v1209_v58 }
 0xb66   :  { %1201 = vadd.xlane.f32.xlu0 %v1200_v60 }
 0xb67   :  { %1204 = vadd.xlane.f32.xlu1 %v1203_v61 }
 0xba6   :  { %v1349_v62 = vpop.xlane.xlu0 %1348 }
 0xba7   :  { %v1358_v63 = vpop.xlane.xlu1 %1357  ;;  %v1359_v24 = vsub.f32 %v3276_v6, %v1349_v62 }
 0xba8   :  { %v1362_v23 = vsub.f32 %v3278_v10, %v1358_v63 }
 0xba9   :  { %v1363_v9 = vmul.f32 1.442695, %v1359_v24 }
 0xbaa   :  { %v1369_v26 = vmul.f32 1.442695, %v1362_v23  ;;  %v1355_v27 = vpop.xlane.xlu0 %1354 }
 0xbab   :  { %v1361_v3 = vsub.f32 %v3280_v12, %v1355_v27  ;;  %v1352_v4 = vpop.xlane.xlu1 %1351 }
 0xbac   :  { %2808 = vpow2.f32 %v1369_v26  ;;  %v1360_v8 = vsub.f32 %v3284_v13, %v1352_v4 }
 0xbad   :  { %v1367_v11 = vmul.f32 1.442695, %v1361_v3 }
 0xbae   :  { %v1365_v0 = vmul.f32 1.442695, %v1360_v8  ;;  %v1519_v2 = vpop.xlane.xlu0 %1518 }
 0xbaf   :  { %2810 = vpow2.f32 %v1367_v11  ;;  %v1528_v14 = vpop.xlane.xlu1 %1527  ;;  %v1529_v6 = vsub.f32 %v3292_v1, %v1519_v2 }
 0xbb0   :  { %2812 = vpow2.f32 %v1365_v0  ;;  %v1532_v15 = vsub.f32 %v3294_v19, %v1528_v14 }
 0xbb1   :  { %2814 = vpow2.f32 %v1363_v9  ;;  %v1533_v18 = vmul.f32 1.442695, %v1529_v6 }
 0xbb2   :  { %v1539_v10 = vmul.f32 1.442695, %v1532_v15  ;;  %v1525_v16 = vpop.xlane.xlu0 %1524 }
 0xbb3   :  { %v1531_v12 = vsub.f32 %v3296_v20, %v1525_v16  ;;  %v1522_v17 = vpop.xlane.xlu1 %1521 }
 0xbb4   :  { %2816 = vpow2.f32 %v1539_v10  ;;  %v1530_v13 = vsub.f32 %v3300_v22, %v1522_v17 }
 0xbb5   :  { %v1537_v5 = vmul.f32 1.442695, %v1531_v12 }
 0xbb6   :  { %v3356_v21 = vpop.eup %2808  ;;  %v1535_v25 = vmul.f32 1.442695, %v1530_v13  ;;  %v1689_v28 = vpop.xlane.xlu0 %1688 }
 0xbb7   :  { %2818 = vpow2.f32 %v1537_v5  ;;  %v1698_v29 = vpop.xlane.xlu1 %1697  ;;  %v1380_v19 = vsel %vm140_vm2, %v3356_v21, 0.0  ;;  %v1699_v22 = vsub.f32 %v3308_v49, %v1689_v28 }
 0xbb8   :  { %2820 = vpow2.f32 %v1535_v25  ;;  %v1702_v1 = vsub.f32 %v3310_v43, %v1698_v29  ;;  %1381 = vadd.xlane.f32.xlu1 %v1380_v19 }
 0xbb9   :  { %v3361_v20 = vpop.eup %2810  ;;  %2822 = vpow2.f32 %v1533_v18  ;;  %v1703_v49 = vmul.f32 1.442695, %v1699_v22 }
 0xbba   :  { %v3364_v30 = vpop.eup %2812  ;;  %v1709_v45 = vmul.f32 1.442695, %v1702_v1  ;;  %v1695_v32 = vpop.xlane.xlu0 %1694  ;;  %v1377_v47 = vsel %vm140_vm2, %v3361_v20, 0.0 }
 0xbbb   :  { %v3368_v7 = vpop.eup %2814  ;;  %v1701_v35 = vsub.f32 %v3312_v33, %v1695_v32  ;;  %1378 = vadd.xlane.f32.xlu0 %v1377_v47  ;;  %v1692_v36 = vpop.xlane.xlu1 %1691  ;;  %v1374_v43 = vsel %vm140_vm2, %v3364_v30, 0.0 }
 0xbbc   :  { %2824 = vpow2.f32 %v1709_v45  ;;  %v1700_v37 = vsub.f32 %v3316_v34, %v1692_v36  ;;  %1375 = vadd.xlane.f32.xlu1 %v1374_v43  ;;  %v1371_v44 = vsel %vm140_vm2, %v3368_v7, 0.0 }
 0xbbd   :  { %v1707_v39 = vmul.f32 1.442695, %v1701_v35 }
 0xbbe   :  { %v3374_v40 = vpop.eup %2816  ;;  %v1705_v41 = vmul.f32 1.442695, %v1700_v37  ;;  %v1224_v42 = vpop.permute.xlu0 %1223 }
 0xbbf   :  { %2826 = vpow2.f32 %v1707_v39  ;;  %v1232_v33 = vsel %vm657_vm4, %v1224_v42, 0  ;;  %2741 = vmatprep.subr.msk.bf16.mxu1 %vm657_vm4, %v1224_v42  ;;  %1372 = vadd.xlane.f32.xlu0 %v1371_v44  ;;  %v1394_v38 = vpop.permute.xlu1 %1393  ;;  %v1550_v34 = vsel %vm140_vm2, %v3374_v40, 0.0 }
 0xbc0   :  { %2828 = vpow2.f32 %v1705_v41  ;;  %2653 = vmatpush3.bf16.msra.mxu1 %v1232_v33  ;;  %1551 = vadd.xlane.f32.xlu1 %v1550_v34  ;;  %v1402_v16 = vsel %vm657_vm4, %v1394_v38, 0 }
 0xbc1   :  { %v3382_v46 = vpop.eup %2818  ;;  %2830 = vpow2.f32 %v1703_v49  ;;  %2743 = vmatprep.subr.msk.bf16.mxu1 %vm657_vm4, %v1394_v38 }
 0xbc2   :  { %v3385_v48 = vpop.eup %2820  ;;  %v1547_v50 = vsel %vm140_vm2, %v3382_v46, 0.0 }
 0xbc3   :  { %v3389_v51 = vpop.eup %2822  ;;  %1548 = vadd.xlane.f32.xlu0 %v1547_v50  ;;  %v1544_v52 = vsel %vm140_vm2, %v3385_v48, 0.0 }
 0xbc4   :  { %1545 = vadd.xlane.f32.xlu1 %v1544_v52  ;;  %v1541_v56 = vsel %vm140_vm2, %v3389_v51, 0.0 }
 0xbc6   :  { %v3393_v53 = vpop.eup %2824 }
 0xbc7   :  { %1542 = vadd.xlane.f32.xlu0 %v1541_v56  ;;  %v1720_v58 = vsel %vm140_vm2, %v3393_v53, 0.0 }
 0xbc8   :  { %1721 = vadd.xlane.f32.xlu1 %v1720_v58 }
 0xbc9   :  { %v3399_v60 = vpop.eup %2826 }
 0xbca   :  { %v3401_v61 = vpop.eup %2828  ;;  %v1717_v62 = vsel %vm140_vm2, %v3399_v60, 0.0 }
 0xbcb   :  { %v3405_v63 = vpop.eup %2830  ;;  %1718 = vadd.xlane.f32.xlu0 %v1717_v62  ;;  %v1714_v23 = vsel %vm140_vm2, %v3401_v61, 0.0 }
 0xbcc   :  { %1715 = vadd.xlane.f32.xlu1 %v1714_v23  ;;  %v1711_v24 = vsel %vm140_vm2, %v3405_v63, 0.0 }
 0xbcf   :  { %1712 = vadd.xlane.f32.xlu0 %v1711_v24 }
 0xbdd   :  { %1563 = vrot.lane.b32.xlu1 %v3226_v31, %s2930_s29  ;;  %s2942_s29 = smov [#allocation2]  }
 0xbde   :  { %s2374_s30 = sshll.u32 %s2942_s29, 4  ;;  %s2375_s30 = int_to_ptr.vmem [resolvable:$true] %s2374_s30 }
 0xbdf   :  { %p2905_p1 = scmp.lt.s32.totalorder %s2375_s30, %s2375_s30 }
 0xbe5   :  { %1733 = vrot.lane.b32.xlu0 %v3226_v31, %s2932_s12 }
 0xbef   :  { %v1208_v26 = vpop.xlane.xlu0 %1207 }
 0xbf0   :  { %v1211_v27 = vpop.xlane.xlu1 %1210  ;;  %2832 = vrcp.f32 %v1208_v26 }
 0xbf1   :  { %2834 = vrcp.f32 %v1211_v27 }
 0xbf3   :  { %v1202_v3 = vpop.xlane.xlu0 %1201 }
 0xbf4   :  { %2836 = vrcp.f32 %v1202_v3  ;;  %v1205_v4 = vpop.xlane.xlu1 %1204 }
 0xbf5   :  { %2838 = vrcp.f32 %v1205_v4 }
 0xbfa   :  { %v2833_v8 = vpop.eup %2832 }
 0xbfb   :  { %v2835_v9 = vpop.eup %2834  ;;  %v1218_v2 = vmul.f32 %v2833_v8, %v3332_v54 }
 0xbfc   :  { %v1219_v14 = vmul.f32 %v2835_v9, %v3334_v55 }
 0xbfe   :  { %v2837_v11 = vpop.eup %2836  ;;  %v1221_v10 = vpack.c.bf16 %v1219_v14, %v1218_v2 }
 0xbff   :  { %v2839_v0 = vpop.eup %2838  ;;  %v1216_v15 = vmul.f32 %v2837_v11, %v3338_v57 }
 0xc00   :  { %v1217_v31 = vmul.f32 %v2839_v0, %v3342_v59 }
 0xc02   :  { %v1220_v6 = vpack.c.bf16 %v1217_v31, %v1216_v15  ;;  %v2777_v15 = vld [vmem:[%s3617_s7 + $0x8] sm:$0xff]  }
 0xc04   :  { %2654 = vmatprep.mubr.msk.bf16.mxu1 %vm140_vm2, %v1220_v6 }
 0xc05   :  { %2655 = vmatmul.mubr.msk.bf16.vlgmr.msra.gmra.mrb[32].mxu1 %vm140_vm2, %v1221_v10 }
 0xc06   :  { %2665 = vmatpush3.bf16.msra.mxu1 %v1402_v16 }
 0xc45   :  { %v1382_v12 = vpop.xlane.xlu1 %1381 }
 0xc48   :  { %v1379_v17 = vpop.xlane.xlu0 %1378 }
 0xc49   :  { %v1376_v13 = vpop.xlane.xlu1 %1375  ;;  %2840 = vrcp.f32 %v1379_v17 }
 0xc4a   :  { %2842 = vrcp.f32 %v1376_v13 }
 0xc4b   :  { %2844 = vrcp.f32 %v1382_v12 }
 0xc4c   :  { %v1373_v54 = vpop.xlane.xlu0 %1372 }
 0xc4d   :  { %2846 = vrcp.f32 %v1373_v54  ;;  %v1552_v55 = vpop.xlane.xlu1 %1551 }
 0xc50   :  { %v1549_v57 = vpop.xlane.xlu0 %1548 }
 0xc51   :  { %v1546_v59 = vpop.xlane.xlu1 %1545  ;;  %2848 = vrcp.f32 %v1549_v57 }
 0xc52   :  { %2850 = vrcp.f32 %v1546_v59 }
 0xc53   :  { %v2841_v18 = vpop.eup %2840  ;;  %2852 = vrcp.f32 %v1552_v55 }
 0xc54   :  { %v1543_v5 = vpop.xlane.xlu0 %1542  ;;  %v2843_v25 = vpop.eup %2842  ;;  %v1389_v1 = vmul.f32 %v2841_v18, %v3361_v20 }
 0xc55   :  { %2854 = vrcp.f32 %v1543_v5  ;;  %v1722_v28 = vpop.xlane.xlu1 %1721  ;;  %v2845_v29 = vpop.eup %2844  ;;  %v1388_v32 = vmul.f32 %v2843_v25, %v3364_v30 }
 0xc56   :  { %v1390_v47 = vmul.f32 %v2845_v29, %v3356_v21 }
 0xc57   :  { %v2847_v19 = vpop.eup %2846 }
 0xc58   :  { %v1719_v22 = vpop.xlane.xlu0 %1718  ;;  %v1387_v45 = vmul.f32 %v2847_v19, %v3368_v7  ;;  %v1392_v43 = vpack.c.bf16 %v1390_v47, %v1389_v1 }
 0xc59   :  { %v1716_v35 = vpop.xlane.xlu1 %1715  ;;  %2856 = vrcp.f32 %v1719_v22 }
 0xc5a   :  { %v1391_v36 = vpack.c.bf16 %v1388_v32, %v1387_v45  ;;  %2858 = vrcp.f32 %v1716_v35  ;;  %v2896_v35 = vld [vmem:[%s3610_s0] sm:$0xff] }
 0xc5b   :  { %v2849_v37 = vpop.eup %2848  ;;  %2860 = vrcp.f32 %v1722_v28 }
 0xc5c   :  { %v1713_v49 = vpop.xlane.xlu0 %1712  ;;  %2666 = vmatprep.mubr.msk.bf16.mxu1 %vm140_vm2, %v1391_v36  ;;  %v2851_v39 = vpop.eup %2850  ;;  %v1559_v41 = vmul.f32 %v2849_v37, %v3382_v46 }
 0xc5d   :  { %2862 = vrcp.f32 %v1713_v49  ;;  %2667 = vmatmul.mubr.msk.bf16.vlgmr.msra.gmra.mrb[36].mxu1 %vm140_vm2, %v1392_v43  ;;  %v1564_v20 = vpop.permute.xlu1 %1563  ;;  %v2853_v7 = vpop.eup %2852  ;;  %v1558_v33 = vmul.f32 %v2851_v39, %v3385_v48  ;;  %v2897_v43 = vld [vmem:[%s3610_s0 + $0x8] sm:$0xff] }
 0xc5e   :  { %v1572_v30 = vsel %vm657_vm4, %v1564_v20, 0  ;;  %2745 = vmatprep.subr.msk.bf16.mxu1 %vm657_vm4, %v1564_v20  ;;  %v1560_v38 = vmul.f32 %v2853_v7, %v3374_v40 }
 0xc5f   :  { %v2855_v21 = vpop.eup %2854  ;;  %2677 = vmatpush3.bf16.msra.mxu1 %v1572_v30 }
 0xc60   :  { %v1734_v42 = vpop.permute.xlu0 %1733  ;;  %v1557_v44 = vmul.f32 %v2855_v21, %v3389_v51  ;;  %v1562_v50 = vpack.c.bf16 %v1560_v38, %v1559_v41 }
 0xc61   :  { %2747 = vmatprep.subr.msk.bf16.mxu1 %vm657_vm4, %v1734_v42  ;;  %v1742_v58 = vsel %vm657_vm4, %v1734_v42, 0  ;;  %v2898_v42 = vld [vmem:[%s3610_s0 + $0x10] sm:$0xff] }
 0xc62   :  { %v1561_v34 = vpack.c.bf16 %v1558_v33, %v1557_v44  ;;  %v2899_v33 = vld [vmem:[%s3610_s0 + $0x18] sm:$0xff] }
 0xc63   :  { %v2857_v52 = vpop.eup %2856 }
 0xc64   :  { %2678 = vmatprep.mubr.msk.bf16.mxu1 %vm140_vm2, %v1561_v34  ;;  %v2859_v56 = vpop.eup %2858  ;;  %v1729_v51 = vmul.f32 %v2857_v52, %v3399_v60 }
 0xc65   :  { %2679 = vmatmul.mubr.msk.bf16.vlgmr.msra.gmra.mrb[40].mxu1 %vm140_vm2, %v1562_v50  ;;  %v2861_v46 = vpop.eup %2860  ;;  %v1728_v40 = vmul.f32 %v2859_v56, %v3401_v61  ;;  %v2428_v50 = vld [vmem:[%s3620_s10 + $0x1] ss:$0 sm:$0xff] }
 0xc66   :  { %2689 = vmatpush3.bf16.msra.mxu1 %v1742_v58  ;;  %v1730_v23 = vmul.f32 %v2861_v46, %v3393_v53  ;;  %v2776_v53 = vld [vmem:[%s3617_s7] sm:$0xff]  }
 0xc67   :  { %v2863_v62 = vpop.eup %2862  ;;  %2694 = vmatprep.subr.bf16.mxu0 %v2776_v53 }
 0xc68   :  { %v1727_v48 = vmul.f32 %v2863_v62, %v3405_v63  ;;  %v1732_v26 = vpack.c.bf16 %v1730_v23, %v1729_v51  ;;  %2695 = vmatpush3.bf16.msra.mxu0 %v2776_v53 }
 0xc69   :  { %2696 = vmatprep.subr.bf16.mxu0 %v2777_v15 }
 0xc6a   :  { %v1731_v24 = vpack.c.bf16 %v1728_v40, %v1727_v48 }
 0xc6c   :  { %2690 = vmatprep.mubr.msk.bf16.mxu1 %vm140_vm2, %v1731_v24  ;;  %2697 = vmatpush3.bf16.msra.mxu0 %v2777_v15 }
 0xc6d   :  { %2691 = vmatmul.mubr.msk.bf16.vlgmr.msra.gmra.mrb[44].mxu1 %vm140_vm2, %v1732_v26 }
 0xcd8   :  { %v2656_v27 = vpop.f32.mrb[32].mxu1 }
 0xcd9   :  { %v1268_v3 = vpop.f32.mrb[33].mxu1 }
 0xcda   :  { %v2657_v4 = vpop.f32.mrb[34].mxu1 }
 0xcdb   :  { %v1271_v8 = vpop.f32.mrb[35].mxu1 }
 0xd30   :  { %v2668_v9 = vpop.f32.mrb[36].mxu1 }
 0xd31   :  { %1801 = vrot.lane.b32.xlu1 %v2668_v9, %s2939_s18  ;;  %v1438_v60 = vpop.f32.mrb[37].mxu1 }
 0xd32   :  { %v2669_v11 = vpop.f32.mrb[38].mxu1 }
 0xd33   :  { %1803 = vrot.lane.b32.xlu0 %v2669_v11, %s2939_s18  ;;  %v1441_v61 = vpop.f32.mrb[39].mxu1 }
 0xd35   :  { %1797 = vrot.lane.b32.xlu1 %v1438_v60, %s2939_s18 }
 0xd37   :  { %1799 = vrot.lane.b32.xlu0 %v1441_v61, %s2939_s18 }
 0xd38   :  { %v2680_v63 = vpop.f32.mrb[40].mxu1 }
 0xd39   :  { %1817 = vrot.lane.b32.xlu1 %v2680_v63, %s2940_s23  ;;  %v1608_v0 = vpop.f32.mrb[41].mxu1 }
 0xd3a   :  { %v2681_v2 = vpop.f32.mrb[42].mxu1 }
 0xd3b   :  { %1819 = vrot.lane.b32.xlu0 %v2681_v2, %s2940_s23  ;;  %v1611_v14 = vpop.f32.mrb[43].mxu1 }
 0xd3d   :  { %1813 = vrot.lane.b32.xlu1 %v1608_v0, %s2940_s23 }
 0xd3f   :  { %1815 = vrot.lane.b32.xlu0 %v1611_v14, %s2940_s23 }
 0xd40   :  { %v2692_v31 = vpop.f32.mrb[44].mxu1 }
 0xd41   :  { %v1778_v6 = vpop.f32.mrb[45].mxu1 }
 0xd42   :  { %1829 = vrot.lane.b32.xlu1 %v1778_v6, %s2941_s24  ;;  %v2693_v10 = vpop.f32.mrb[46].mxu1 }
 0xd43   :  { %v1781_v16 = vpop.f32.mrb[47].mxu1 }
 0xd44   :  { %1831 = vrot.lane.b32.xlu0 %v1781_v16, %s2941_s24 }
 0xd46   :  { %1833 = vrot.lane.b32.xlu1 %v2692_v31, %s2941_s24 }
 0xd48   :  { %1835 = vrot.lane.b32.xlu0 %v2693_v10, %s2941_s24 }
 0xda3   :  { %v1802_v12 = vpop.permute.xlu1 %1801 }
 0xda4   :  { %v1843_v45 = vsel %vm140_vm2, %v2656_v27, %v1802_v12 }
 0xda5   :  { %v1804_v17 = vpop.permute.xlu0 %1803 }
 0xda6   :  { %v1844_v39 = vsel %vm140_vm2, %v2657_v4, %v1804_v17 }
 0xda7   :  { %v1798_v13 = vpop.permute.xlu1 %1797 }
 0xda8   :  { %v1841_v5 = vsel %vm140_vm2, %v1268_v3, %v1798_v13 }
 0xda9   :  { %v1800_v54 = vpop.permute.xlu0 %1799 }
 0xdaa   :  { %v1842_v29 = vsel %vm140_vm2, %v1271_v8, %v1800_v54 }
 0xdab   :  { %v1818_v55 = vpop.permute.xlu1 %1817 }
 0xdac   :  { %v1847_v47 = vsel %vm1045_vm5, %v1843_v45, %v1818_v55 }
 0xdad   :  { %v1820_v57 = vpop.permute.xlu0 %1819 }
 0xdae   :  { %v1848_v7 = vsel %vm1045_vm5, %v1844_v39, %v1820_v57 }
 0xdaf   :  { %v1814_v59 = vpop.permute.xlu1 %1813 }
 0xdb0   :  { %v1845_v25 = vsel %vm1045_vm5, %v1841_v5, %v1814_v59  ;;  %v2779_v5 = vld [vmem:[%s3618_s8 + $0x8] sm:$0xff]  }
 0xdb1   :  { %v1816_v18 = vpop.permute.xlu0 %1815 }
 0xdb2   :  { %v1846_v1 = vsel %vm1045_vm5, %v1842_v29, %v1816_v18  ;;  %v2778_v18 = vld [vmem:[%s3618_s8] sm:$0xff]  }
 0xdb3   :  { %2702 = vmatprep.subr.bf16.mxu1 %v2778_v18 }
 0xdb4   :  { %v1830_v28 = vpop.permute.xlu1 %1829  ;;  %2703 = vmatpush3.bf16.msra.mxu1 %v2778_v18 }
 0xdb5   :  { %v1849_v19 = vsel %vm1047_vm6, %v1845_v25, %v1830_v28  ;;  %2704 = vmatprep.subr.bf16.mxu1 %v2779_v5 }
 0xdb6   :  { %v1832_v22 = vpop.permute.xlu0 %1831  ;;  %v1853_v36 = vadd.f32 %v2896_v35, %v1849_v19 }
 0xdb7   :  { %v1850_v32 = vsel %vm1047_vm6, %v1846_v1, %v1832_v22 }
 0xdb8   :  { %v1854_v37 = vadd.f32 %v2897_v43, %v1850_v32  ;;  %v1834_v49 = vpop.permute.xlu1 %1833  ;;  %2705 = vmatpush3.bf16.msra.mxu1 %v2779_v5 }
 0xdb9   :  { %v1851_v20 = vsel %vm1047_vm6, %v1847_v47, %v1834_v49  ;;  %v2433_v49 = vld [vmem:[%s3620_s10 + $0x2] ss:$0 sm:$0xff] }
 0xdba   :  { %v1857_v30 = vpack.c.bf16 %v1854_v37, %v1853_v36  ;;  %v1836_v21 = vpop.permute.xlu0 %1835  ;;  %v1855_v44 = vadd.f32 %v2898_v42, %v1851_v20 }
 0xdbb   :  { %v1852_v41 = vsel %vm1047_vm6, %v1848_v7, %v1836_v21  ;;  %v2434_v21 = vld [vmem:[%s3620_s10 + $0x3] ss:$0 sm:$0xff] }
 0xdbc   :  { %v1856_v38 = vadd.f32 %v2899_v33, %v1852_v41  ;;  %2698 = vmatprep.mubr.msk.bf16.mxu0 %vm53_vm1, %v1857_v30 }
 0xdbe   :  { %v1858_v34 = vpack.c.bf16 %v1856_v38, %v1855_v44 }
 0xdc0   :  { %2699 = vmatmul.mubr.msk.bf16.vlgmr.msra.gmra.mrb[40].mxu0 %vm53_vm1, %v1858_v34 }
 0xe93   :  { %v2700_v52 = vpop.f32.mrb[40].mxu0 }
 0xe94   :  { %v1920_v56 = vpop.f32.mrb[41].mxu0  ;;  %v1929_v48 = vadd.f32 %v2700_v52, %v2428_v50 }
 0xe95   :  { %v1921_v58 = vadd.f32 %v2428_v50, %v1920_v56  ;;  %v2701_v46 = vpop.f32.mrb[42].mxu0 }
 0xe96   :  { %v1932_v62 = vadd.f32 %v2701_v46, %v2428_v50  ;;  %v1923_v51 = vpop.f32.mrb[43].mxu0  ;;  %v1937_v4 = vadd.f32 %v2898_v42, %v1929_v48  ;;  %v2780_v48 = vld [vmem:[%s3619_s9] sm:$0xff]  }
 0xe97   :  { %v1924_v40 = vadd.f32 %v2428_v50, %v1923_v51  ;;  %v1935_v23 = vadd.f32 %v2896_v35, %v1921_v58  ;;  %2710 = vmatprep.subr.bf16.mxu0 %v2780_v48 }
 0xe98   :  { %v1938_v27 = vadd.f32 %v2899_v33, %v1932_v62  ;;  %v1947_v9 = vsel %vm53_vm1, %v1937_v4, 0.0  ;;  %2711 = vmatpush3.bf16.msra.mxu0 %v2780_v48 }
 0xe99   :  { %v1941_v24 = vsel %vm53_vm1, %v1935_v23, 0.0  ;;  %v1936_v26 = vadd.f32 %v2897_v43, %v1924_v40  ;;  %v2781_v40 = vld [vmem:[%s3619_s9 + $0x8] sm:$0xff]  }
 0xe9a   :  { %1942 = vadd.xlane.f32.xlu1 %v1941_v24  ;;  %v1950_v8 = vsel %vm53_vm1, %v1938_v27, 0.0  ;;  %2712 = vmatprep.subr.bf16.mxu0 %v2781_v40  ;;  %v2783_v24 = vld [vmem:[%s3619_s9 + $0x18] sm:$0xff]  }
 0xe9b   :  { %v1944_v3 = vsel %vm53_vm1, %v1936_v26, 0.0 }
 0xe9c   :  { %1945 = vadd.xlane.f32.xlu0 %v1944_v3  ;;  %2713 = vmatpush3.bf16.msra.mxu0 %v2781_v40 }
 0xe9e   :  { %1951 = vadd.xlane.f32.xlu1 %v1950_v8 }
 0xea0   :  { %1948 = vadd.xlane.f32.xlu0 %v1947_v9 }
 0xf27   :  { %v1943_v60 = vpop.xlane.xlu1 %1942 }
 0xf28   :  { %v1954_v11 = vmul.f32 0.03125, %v1943_v60 }
 0xf29   :  { %v1946_v61 = vpop.xlane.xlu0 %1945 }
 0xf2a   :  { %v1958_v53 = vsub.f32 %v1935_v23, %v1954_v11  ;;  %v1955_v63 = vmul.f32 0.03125, %v1946_v61  ;;  %v2782_v23 = vld [vmem:[%s3619_s9 + $0x10] sm:$0xff]  }
 0xf2b   :  { %v1952_v0 = vpop.xlane.xlu1 %1951  ;;  %2714 = vmatprep.subr.bf16.mxu0 %v2782_v23 }
 0xf2c   :  { %v1959_v2 = vsub.f32 %v1936_v26, %v1955_v63  ;;  %v1957_v14 = vmul.f32 0.03125, %v1952_v0  ;;  %v1962_v15 = vmul.f32 %v1958_v53, %v1958_v53  ;;  %2715 = vmatpush3.bf16.msra.mxu0 %v2782_v23  ;;  %v2435_v26 = vld [vmem:[%s3620_s10 + $0x4] ss:$0 sm:$0xff] }
 0xf2d   :  { %v1949_v31 = vpop.xlane.xlu0 %1948  ;;  %2716 = vmatprep.subr.bf16.mxu0 %v2783_v24 }
 0xf2e   :  { %v1961_v6 = vsub.f32 %v1938_v27, %v1957_v14  ;;  %v1956_v10 = vmul.f32 0.03125, %v1949_v31  ;;  %v1966_v16 = vsel %vm53_vm1, %v1962_v15, 0.0  ;;  %v1963_v12 = vmul.f32 %v1959_v2, %v1959_v2 }
 0xf2f   :  { %1967 = vadd.xlane.f32.xlu0 %v1966_v16 }
 0xf30   :  { %v1960_v17 = vsub.f32 %v1937_v4, %v1956_v10  ;;  %v1969_v13 = vsel %vm53_vm1, %v1963_v12, 0.0  ;;  %v1965_v54 = vmul.f32 %v1961_v6, %v1961_v6  ;;  %2717 = vmatpush3.bf16.msra.mxu0 %v2783_v24 }
 0xf31   :  { %1970 = vadd.xlane.f32.xlu1 %v1969_v13 }
 0xf32   :  { %v1964_v55 = vmul.f32 %v1960_v17, %v1960_v17  ;;  %v1975_v59 = vsel %vm53_vm1, %v1965_v54, 0.0 }
 0xf34   :  { %v1972_v57 = vsel %vm53_vm1, %v1964_v55, 0.0 }
 0xf35   :  { %1973 = vadd.xlane.f32.xlu0 %v1972_v57  ;;  %1976 = vadd.xlane.f32.xlu1 %v1975_v59 }
 0xfbc   :  { %v1968_v25 = vpop.xlane.xlu0 %1967 }
 0xfbd   :  { %v1978_v28 = vmul.f32 0.03125, %v1968_v25 }
 0xfbe   :  { %v1971_v29 = vpop.xlane.xlu1 %1970 }
 0xfbf   :  { %v1982_v19 = vadd.f32 1e-12, %v1978_v28  ;;  %v1979_v1 = vmul.f32 0.03125, %v1971_v29 }
 0xfc1   :  { %2864 = vrsqrt.f32 %v1982_v19  ;;  %v1983_v22 = vadd.f32 1e-12, %v1979_v1 }
 0xfc2   :  { %v1974_v45 = vpop.xlane.xlu0 %1973  ;;  %v1977_v32 = vpop.xlane.xlu1 %1976 }
 0xfc3   :  { %2866 = vrsqrt.f32 %v1983_v22  ;;  %v1980_v47 = vmul.f32 0.03125, %v1974_v45  ;;  %v1981_v35 = vmul.f32 0.03125, %v1977_v32 }
 0xfc5   :  { %v1984_v36 = vadd.f32 1e-12, %v1980_v47  ;;  %v1985_v43 = vadd.f32 1e-12, %v1981_v35 }
 0xfc7   :  { %2868 = vrsqrt.f32 %v1984_v36 }
 0xfc8   :  { %2870 = vrsqrt.f32 %v1985_v43 }
 0xfcb   :  { %v2865_v37 = vpop.eup %2864 }
 0xfcc   :  { %v1990_v39 = vmul.f32 %v2865_v37, %v1958_v53 }
 0xfcd   :  { %v2867_v20 = vpop.eup %2866 }
 0xfce   :  { %v1991_v7 = vmul.f32 %v2867_v20, %v1959_v2  ;;  %v1998_v30 = vmul.f32 %v2433_v49, %v1990_v39 }
 0xfd0   :  { %v1999_v41 = vmul.f32 %v2433_v49, %v1991_v7  ;;  %v3511_v38 = vadd.f32 %v2434_v21, %v1998_v30 }
 0xfd1   :  { %v2869_v42 = vpop.eup %2868 }
 0xfd2   :  { %v2871_v44 = vpop.eup %2870  ;;  %v1992_v33 = vmul.f32 %v2869_v42, %v1960_v17  ;;  %v3513_v34 = vadd.f32 %v2434_v21, %v1999_v41 }
 0xfd3   :  { %v1993_v50 = vmul.f32 %v2871_v44, %v1961_v6 }
 0xfd4   :  { %v2000_v52 = vmul.f32 %v2433_v49, %v1992_v33  ;;  %v2010_v56 = vpack.c.bf16 %v3513_v34, %v3511_v38 }
 0xfd5   :  { %v2001_v58 = vmul.f32 %v2433_v49, %v1993_v50 }
 0xfd6   :  { %2706 = vmatprep.mubr.msk.bf16.mxu1 %vm53_vm1, %v2010_v56  ;;  %v3518_v46 = vadd.f32 %v2434_v21, %v2000_v52 }
 0xfd7   :  { %v3520_v62 = vadd.f32 %v2434_v21, %v2001_v58 }
 0xfd9   :  { %v2011_v51 = vpack.c.bf16 %v3520_v62, %v3518_v46 }
 0xfdb   :  { %2707 = vmatmul.mubr.msk.bf16.vlgmr.msra.gmra.mrb[48].mxu1 %vm53_vm1, %v2011_v51 }
0x10ae   :  { %v2708_v27 = vpop.f32.mrb[48].mxu1 }
0x10af   :  { %v3540_v3 = vadd.f32 %v2708_v27, %v2435_v26  ;;  %v2073_v4 = vpop.f32.mrb[49].mxu1 }
0x10b0   :  { %v3542_v8 = vadd.f32 %v2435_v26, %v2073_v4  ;;  %v2709_v9 = vpop.f32.mrb[50].mxu1 }
0x10b1   :  { %v3545_v60 = vmul.f32 0.70710677, %v3540_v3  ;;  %v3547_v11 = vadd.f32 %v2709_v9, %v2435_v26  ;;  %v2076_v61 = vpop.f32.mrb[51].mxu1 }
0x10b2   :  { %v3550_v53 = vmul.f32 0.70710677, %v3542_v8  ;;  %v3552_v63 = vadd.f32 %v2435_v26, %v2076_v61 }
0x10b3   :  { %v2098_v0 = vand.u32 2147483647, %v3545_v60  ;;  %v3556_v2 = vmul.f32 0.70710677, %v3547_v11  ;;  %vm2178_vm7 = vcmp.lt.f32.partialorder %v3545_v60, 0.0 }
0x10b4   :  { %v2096_v14 = vand.u32 2147483647, %v3550_v53  ;;  %v3560_v15 = vmul.f32 0.70710677, %v3552_v63  ;;  %vm2176_vm8 = vcmp.lt.f32.partialorder %v3550_v53, 0.0 }
0x10b5   :  { %v2102_v31 = vmul.f32 0.3275911, %v2098_v0  ;;  %v2099_v6 = vand.u32 2147483647, %v3556_v2  ;;  %v2154_v59 = vmul.f32 %v2098_v0, %v2098_v0  ;;  %vm2179_vm9 = vcmp.lt.f32.partialorder %v3556_v2, 0.0 }
0x10b6   :  { %v2100_v10 = vmul.f32 0.3275911, %v2096_v14  ;;  %v2097_v16 = vand.u32 2147483647, %v3560_v15  ;;  %v2152_v18 = vmul.f32 %v2096_v14, %v2096_v14  ;;  %vm2177_vm10 = vcmp.lt.f32.partialorder %v3560_v15, 0.0 }
0x10b7   :  { %v2106_v12 = vadd.f32 1.0, %v2102_v31  ;;  %v2103_v17 = vmul.f32 0.3275911, %v2099_v6  ;;  %v2158_v25 = vsub.f32 0.0, %v2154_v59  ;;  %v2155_v28 = vmul.f32 %v2099_v6, %v2099_v6 }
0x10b8   :  { %v2104_v13 = vadd.f32 1.0, %v2100_v10  ;;  %v2101_v54 = vmul.f32 0.3275911, %v2097_v16  ;;  %v2156_v1 = vsub.f32 0.0, %v2152_v18  ;;  %v2153_v45 = vmul.f32 %v2097_v16, %v2097_v16 }
0x10b9   :  { %2872 = vrcp.f32 %v2106_v12  ;;  %v2107_v55 = vadd.f32 1.0, %v2103_v17  ;;  %v2164_v35 = vmul.f32 1.442695, %v2158_v25  ;;  %v2159_v43 = vsub.f32 0.0, %v2155_v28 }
0x10ba   :  { %2874 = vrcp.f32 %v2104_v13  ;;  %v2105_v57 = vadd.f32 1.0, %v2101_v54  ;;  %v2160_v49 = vmul.f32 1.442695, %v2156_v1  ;;  %v2157_v30 = vsub.f32 0.0, %v2153_v45 }
0x10bb   :  { %2876 = vrcp.f32 %v2107_v55  ;;  %v2166_v33 = vmul.f32 1.442695, %v2159_v43 }
0x10bc   :  { %2878 = vrcp.f32 %v2105_v57  ;;  %v2162_v51 = vmul.f32 1.442695, %v2157_v30 }
0x10bd   :  { %2880 = vpow2.f32 %v2164_v35 }
0x10be   :  { %2882 = vpow2.f32 %v2160_v49 }
0x10bf   :  { %2884 = vpow2.f32 %v2166_v33 }
0x10c0   :  { %2886 = vpow2.f32 %v2162_v51 }
0x10c3   :  { %v2873_v5 = vpop.eup %2872 }
0x10c4   :  { %v2875_v29 = vpop.eup %2874  ;;  %v2118_v19 = vmul.f32 1.0614054, %v2873_v5 }
0x10c5   :  { %v2116_v22 = vmul.f32 1.0614054, %v2875_v29  ;;  %v2877_v47 = vpop.eup %2876 }
0x10c6   :  { %v2122_v32 = vadd.f32 -1.4531521, %v2118_v19  ;;  %v2119_v39 = vmul.f32 1.0614054, %v2877_v47  ;;  %v2879_v20 = vpop.eup %2878 }
0x10c7   :  { %v2120_v36 = vadd.f32 -1.4531521, %v2116_v22  ;;  %v2117_v42 = vmul.f32 1.0614054, %v2879_v20  ;;  %v2881_v12 = vpop.eup %2880 }
0x10c8   :  { %v2126_v37 = vmul.f32 %v2873_v5, %v2122_v32  ;;  %v2123_v41 = vadd.f32 -1.4531521, %v2119_v39  ;;  %v2883_v13 = vpop.eup %2882 }
0x10c9   :  { %v2124_v7 = vmul.f32 %v2875_v29, %v2120_v36  ;;  %v2121_v56 = vadd.f32 -1.4531521, %v2117_v42  ;;  %v2885_v19 = vpop.eup %2884  ;;  %v2088_v42 = vmul.f32 0.5, %v3542_v8 }
0x10ca   :  { %v2130_v21 = vadd.f32 1.4214138, %v2126_v37  ;;  %v2127_v52 = vmul.f32 %v2877_v47, %v2123_v41  ;;  %v2887_v35 = vpop.eup %2886  ;;  %v2091_v41 = vmul.f32 0.5, %v3547_v11  ;;  %v2440_v11 = vld [vmem:[%s3620_s10 + $0x5] ss:$0 sm:$0xff] }
0x10cb   :  { %v2128_v44 = vadd.f32 1.4214138, %v2124_v7  ;;  %v2125_v23 = vmul.f32 %v2879_v20, %v2121_v56 }
0x10cc   :  { %v2134_v50 = vmul.f32 %v2873_v5, %v2130_v21  ;;  %v2131_v40 = vadd.f32 1.4214138, %v2127_v52 }
0x10cd   :  { %v2132_v58 = vmul.f32 %v2875_v29, %v2128_v44  ;;  %v2129_v4 = vadd.f32 1.4214138, %v2125_v23 }
0x10ce   :  { %v2138_v48 = vadd.f32 -0.28449672, %v2134_v50  ;;  %v2135_v27 = vmul.f32 %v2877_v47, %v2131_v40  ;;  %v2089_v50 = vmul.f32 0.5, %v3552_v63 }
0x10cf   :  { %v2136_v24 = vadd.f32 -0.28449672, %v2132_v58  ;;  %v2133_v14 = vmul.f32 %v2879_v20, %v2129_v4 }
0x10d0   :  { %v2142_v26 = vmul.f32 %v2873_v5, %v2138_v48  ;;  %v2139_v0 = vadd.f32 -0.28449672, %v2135_v27 }
0x10d1   :  { %v2140_v9 = vmul.f32 %v2875_v29, %v2136_v24  ;;  %v2137_v16 = vadd.f32 -0.28449672, %v2133_v14 }
0x10d2   :  { %v2146_v61 = vadd.f32 0.2548296, %v2142_v26  ;;  %v2143_v10 = vmul.f32 %v2877_v47, %v2139_v0 }
0x10d3   :  { %v2144_v31 = vadd.f32 0.2548296, %v2140_v9  ;;  %v2141_v57 = vmul.f32 %v2879_v20, %v2137_v16 }
0x10d4   :  { %v2150_v6 = vmul.f32 %v2873_v5, %v2146_v61  ;;  %v2147_v55 = vadd.f32 0.2548296, %v2143_v10 }
0x10d5   :  { %v2148_v17 = vmul.f32 %v2875_v29, %v2144_v31  ;;  %v2145_v28 = vadd.f32 0.2548296, %v2141_v57 }
0x10d6   :  { %v2170_v54 = vmul.f32 %v2881_v12, %v2150_v6  ;;  %v2151_v25 = vmul.f32 %v2877_v47, %v2147_v55  ;;  %v2090_v47 = vmul.f32 0.5, %v3540_v3 }
0x10d7   :  { %v2168_v59 = vmul.f32 %v2883_v13, %v2148_v17  ;;  %v2149_v32 = vmul.f32 %v2879_v20, %v2145_v28 }
0x10d8   :  { %v2174_v18 = vsub.f32 1.0, %v2170_v54  ;;  %v2171_v45 = vmul.f32 %v2885_v19, %v2151_v25 }
0x10d9   :  { %v2172_v1 = vsub.f32 1.0, %v2168_v59  ;;  %v2169_v29 = vmul.f32 %v2887_v35, %v2149_v32 }
0x10da   :  { %v2182_v22 = vsub.f32 0.0, %v2174_v18  ;;  %v2175_v43 = vsub.f32 1.0, %v2171_v45 }
0x10db   :  { %v2180_v5 = vsub.f32 0.0, %v2172_v1  ;;  %v2173_v39 = vsub.f32 1.0, %v2169_v29 }
0x10dc   :  { %v2186_v36 = vsel %vm2178_vm7, %v2182_v22, %v2174_v18  ;;  %v2183_v49 = vsub.f32 0.0, %v2175_v43 }
0x10dd   :  { %v2184_v37 = vsel %vm2176_vm8, %v2180_v5, %v2172_v1  ;;  %v2190_v7 = vadd.f32 1.0, %v2186_v36  ;;  %v2181_v21 = vsub.f32 0.0, %v2173_v39 }
0x10de   :  { %v2187_v30 = vsel %vm2179_vm9, %v2183_v49, %v2175_v43  ;;  %v2188_v20 = vadd.f32 1.0, %v2184_v37 }
0x10df   :  { %v2191_v60 = vadd.f32 1.0, %v2187_v30  ;;  %v2185_v44 = vsel %vm2177_vm10, %v2181_v21, %v2173_v39  ;;  %v2194_v53 = vmul.f32 %v2190_v7, %v2090_v47  ;;  %v2447_v21 = vld [vmem:[%s3620_s10 + $0x6] ss:$0 sm:$0xff] }
0x10e0   :  { %v2189_v52 = vadd.f32 1.0, %v2185_v44  ;;  %v2192_v56 = vmul.f32 %v2188_v20, %v2088_v42 }
0x10e1   :  { %v2195_v33 = vmul.f32 %v2191_v60, %v2091_v41  ;;  %v2448_v60 = vld [vmem:[%s3620_s10 + $0x7] ss:$0 sm:$0xff]  ;;  %s2900_s10 = scalar_lea.vmem %s2375_s30, 512 }
0x10e2   :  { %v2193_v58 = vmul.f32 %v2189_v52, %v2089_v50  ;;  %p2901_p0 = scmp.ne.s32.totalorder %s2375_s30, %s2900_s10  ;;  %p2906_p2 = scmp.lt.s32.totalorder %s2900_s10, %s2900_s10 }
0x10e3   :  { %v2197_v2 = vpack.c.bf16 %v2195_v33, %v2194_v53 }
0x10e4   :  { %v2196_v3 = vpack.c.bf16 %v2193_v58, %v2192_v56  ;;  %p2907_p3 = por %p2906_p2, %p2905_p1 }
0x10e6   :  { %2718 = vmatprep.mubr.msk.bf16.mxu0 %vm2235_vm11, %v2196_v3  ;;  %p2908_p4 = pnand %p2907_p3, %p2901_p0 }
0x10e7   :  { %2719 = vmatmul.mubr.msk.bf16.vlgmr.msra.gmra.mrb[44].mxu0 %vm2235_vm11, %v2197_v2 }
0x11ba   :  { %v2720_v15 = vpop.f32.mrb[44].mxu0 }
0x11bb   :  { %v2276_v51 = vpop.f32.mrb[45].mxu0  ;;  %v2285_v8 = vadd.f32 %v2720_v15, %v2440_v11 }
0x11bc   :  { %v2277_v48 = vadd.f32 %v2440_v11, %v2276_v51  ;;  %v2721_v40 = vpop.f32.mrb[46].mxu0 }
0x11bd   :  { %v2279_v23 = vpop.f32.mrb[47].mxu0  ;;  %v2288_v24 = vadd.f32 %v2721_v40, %v2440_v11  ;;  %v2293_v27 = vadd.f32 %v2285_v8, %v3518_v46 }
0x11be   :  { %v2291_v63 = vadd.f32 %v2277_v48, %v3511_v38  ;;  %v2280_v26 = vadd.f32 %v2440_v11, %v2279_v23 }
0x11bf   :  { %v2294_v61 = vadd.f32 %v2288_v24, %v3520_v62  ;;  %v2303_v14 = vsel %vm53_vm1, %v2293_v27, 0.0 }
0x11c0   :  { %v2292_v4 = vadd.f32 %v2280_v26, %v3513_v34  ;;  %v2297_v9 = vsel %vm53_vm1, %v2291_v63, 0.0 }
0x11c1   :  { %2298 = vadd.xlane.f32.xlu0 %v2297_v9  ;;  %v2306_v31 = vsel %vm53_vm1, %v2294_v61, 0.0 }
0x11c2   :  { %v2300_v0 = vsel %vm53_vm1, %v2292_v4, 0.0 }
0x11c3   :  { %2301 = vadd.xlane.f32.xlu1 %v2300_v0 }
0x11c5   :  { %2304 = vadd.xlane.f32.xlu0 %v2303_v14 }
0x11c7   :  { %2307 = vadd.xlane.f32.xlu1 %v2306_v31 }
0x124e   :  { %v2299_v38 = vpop.xlane.xlu0 %2298 }
0x124f   :  { %v2309_v6 = vmul.f32 0.03125, %v2299_v38 }
0x1250   :  { %v2302_v10 = vpop.xlane.xlu1 %2301 }
0x1251   :  { %v2313_v46 = vsub.f32 %v2291_v63, %v2309_v6  ;;  %v2310_v16 = vmul.f32 0.03125, %v2302_v10 }
0x1252   :  { %v2305_v34 = vpop.xlane.xlu0 %2304 }
0x1253   :  { %v2314_v12 = vsub.f32 %v2292_v4, %v2310_v16  ;;  %v2311_v17 = vmul.f32 0.03125, %v2305_v34  ;;  %v2317_v13 = vmul.f32 %v2313_v46, %v2313_v46 }
0x1254   :  { %v2308_v54 = vpop.xlane.xlu1 %2307 }
0x1255   :  { %v2315_v62 = vsub.f32 %v2293_v27, %v2311_v17  ;;  %v2312_v55 = vmul.f32 0.03125, %v2308_v54  ;;  %v2321_v57 = vsel %vm53_vm1, %v2317_v13, 0.0  ;;  %v2318_v59 = vmul.f32 %v2314_v12, %v2314_v12 }
0x1256   :  { %2322 = vadd.xlane.f32.xlu0 %v2321_v57 }
0x1257   :  { %v2316_v18 = vsub.f32 %v2294_v61, %v2312_v55  ;;  %v2324_v25 = vsel %vm53_vm1, %v2318_v59, 0.0  ;;  %v2319_v28 = vmul.f32 %v2315_v62, %v2315_v62 }
0x1258   :  { %2325 = vadd.xlane.f32.xlu1 %v2324_v25 }
0x1259   :  { %v2327_v19 = vsel %vm53_vm1, %v2319_v28, 0.0  ;;  %v2320_v1 = vmul.f32 %v2316_v18, %v2316_v18 }
0x125a   :  { %2328 = vadd.xlane.f32.xlu0 %v2327_v19 }
0x125b   :  { %v2330_v22 = vsel %vm53_vm1, %v2320_v1, 0.0 }
0x125c   :  { %2331 = vadd.xlane.f32.xlu1 %v2330_v22 }
0x12e3   :  { %v2323_v45 = vpop.xlane.xlu0 %2322 }
0x12e4   :  { %v2333_v32 = vmul.f32 0.03125, %v2323_v45 }
0x12e5   :  { %v2326_v35 = vpop.xlane.xlu1 %2325 }
0x12e6   :  { %v2337_v5 = vadd.f32 1e-12, %v2333_v32  ;;  %v2334_v36 = vmul.f32 0.03125, %v2326_v35 }
0x12e7   :  { %v2329_v43 = vpop.xlane.xlu0 %2328 }
0x12e8   :  { %2888 = vrsqrt.f32 %v2337_v5  ;;  %v2338_v29 = vadd.f32 1e-12, %v2334_v36  ;;  %v2335_v37 = vmul.f32 0.03125, %v2329_v43 }
0x12e9   :  { %v2332_v49 = vpop.xlane.xlu1 %2331 }
0x12ea   :  { %2890 = vrsqrt.f32 %v2338_v29  ;;  %v2339_v39 = vadd.f32 1e-12, %v2335_v37  ;;  %v2336_v7 = vmul.f32 0.03125, %v2332_v49 }
0x12ec   :  { %2892 = vrsqrt.f32 %v2339_v39  ;;  %v2340_v47 = vadd.f32 1e-12, %v2336_v7 }
0x12ee   :  { %2894 = vrsqrt.f32 %v2340_v47 }
0x12f2   :  { %v2889_v30 = vpop.eup %2888 }
0x12f3   :  { %v2345_v20 = vmul.f32 %v2889_v30, %v2313_v46 }
0x12f4   :  { %v2891_v41 = vpop.eup %2890 }
0x12f5   :  { %v2353_v42 = vmul.f32 %v2447_v21, %v2345_v20  ;;  %v2346_v44 = vmul.f32 %v2891_v41, %v2314_v12 }
0x12f6   :  { %v2893_v53 = vpop.eup %2892 }
0x12f7   :  { %v2361_v33 = vadd.f32 %v2448_v60, %v2353_v42  ;;  %v2354_v50 = vmul.f32 %v2447_v21, %v2346_v44  ;;  %v2347_v52 = vmul.f32 %v2893_v53, %v2315_v62 }
0x12f8   :  { %v2895_v56 = vpop.eup %2894 }
0x12f9   :  { %2365 = vst.msk [vmem:[#allocation2] sm:$0xff] %vm53_vm1, %v2361_v33  ;;  %v2362_v2 = vadd.f32 %v2448_v60, %v2354_v50  ;;  %v2355_v58 = vmul.f32 %v2447_v21, %v2347_v52  ;;  %v2348_v3 = vmul.f32 %v2895_v56, %v2316_v18 }
0x12fb   :  { %2366 = vst.msk [vmem:[#allocation2 + $0x8] sm:$0xff] %vm53_vm1, %v2362_v2  ;;  %v2363_v11 = vadd.f32 %v2448_v60, %v2355_v58  ;;  %v2356_v15 = vmul.f32 %v2447_v21, %v2348_v3 }
0x12fd   :  { %2367 = vst.msk [vmem:[#allocation2 + $0x10] sm:$0xff] %vm53_vm1, %v2363_v11  ;;  %v2364_v51 = vadd.f32 %v2448_v60, %v2356_v15 }
0x12ff   :  { %2368 = vst.msk [vmem:[#allocation2 + $0x18] sm:$0xff] %vm53_vm1, %v2364_v51 }
0x1300   :  { %2911 = shalt.err (!%p2908_p4)
}
0x1301   :  { %s2912_s0 = scalar_lea.hbm %s3621_s11, 512 }
0x1302   :  { %p2913_p5 = scmp.ne.s32.totalorder %s3621_s11, %s2912_s0  ;;  %p2916_p6 = scmp.lt.u32.totalorder %s2912_s0, %s3621_s11 }
0x1304   :  { %p2918_p7 = pnand %p2916_p6, %p2913_p5 }
0x1306   :  { %2921 = shalt.err (!%p2918_p7)
}
0x1307   :  { %s2943_s16 = smov 128  }
0x1308   :  { %2380 = dma.vmem_to_hbm [thread:$0]  %s2375_s30, 512, %s3621_s11, [#allocation3], %s2943_s16, %s2943_s16, %s2939_s18  }
0x1309   :  { %2922 = dma.done.wait [#allocation3], 512  }
0x130a   :  { %2923 = vsyncadd [#allocation3], 4294966784 }
0x130b   :  { %2384 = vsyncpa [#allocation3], 1 }

</bundles_post_ra>
